<compile_context>
chip_gen: v7x
topology: tpu7x:2x2x1
jax: 0.10.0
libtpu: 0.0.40
codegen_flags: <defaults>
</compile_context>

<pallas_src>
import functools
import math

import jax
import jax.numpy as jnp
from jax.experimental import pallas as pl
from jax.experimental.pallas import tpu as pltpu

# Model hyper-parameters (match the PyTorch module defaults).
D = 32
F = 32
H = 4
D_H = D // H
F_H = F // H

_LANE = 128


def attention_kernel(scales_ref, xq_ref, xk_ref, xv_ref, out_ref, *, flat_out):
    """One grid step: full attention for a block of `block_b` batch elements."""
    in_dtype = xq_ref.dtype
    scales = scales_ref[...]                        # (2, D) f32
    wqk = scales[0][None, None, :]                  # (1,1,D) diag(W_Q)*diag(W_K)/sqrt(D_H)
    wvo = scales[1][None, None, :]                  # (1,1,F) diag(W_V)*diag(O)

    xq = xq_ref[...]                                # (Bt, Q, D)
    xk = xk_ref[...]                                # (Bt, K, D)
    xv = xv_ref[...]                                # (Bt, K, F)
    bt, q_len, _ = xq.shape

    # Folded Q-side scaling (exact):
    #   scores = sum_d xq_d * xk_d * (wq_d * wk_d) / sqrt(D_H)
    # Elementwise math kept in f32 (v5e has no bf16 VPU path); only the matmul
    # operand is cast back to the input dtype for the MXU.
    q = (xq.astype(jnp.float32) * wqk).astype(in_dtype)

    ys = []
    for h in range(H):                              # H = 4, static loop
        qh = q[:, :, h * D_H:(h + 1) * D_H]         # (Bt, Q, D_H)
        kh = xk[:, :, h * D_H:(h + 1) * D_H]        # (Bt, K, D_H)
        vh = xv[:, :, h * F_H:(h + 1) * F_H]        # (Bt, K, F_H)

        # scores[b,q,k] = sum_d qh * kh   (scale already folded into q)
        s = jnp.einsum('bqd,bkd->bqk', qh, kh,
                       preferred_element_type=jnp.float32)          # (Bt, Q, K)

        # Numerically-stable softmax; normalization deferred until after PV so
        # the reciprocal multiply is (Bt,Q,F_H) instead of (Bt,Q,K).
        m = jnp.max(s, axis=-1, keepdims=True)
        p = jnp.exp(s - m)
        l = jnp.sum(p, axis=-1, keepdims=True)

        y = jnp.einsum('bqk,bkf->bqf', p.astype(vh.dtype), vh,
                       preferred_element_type=jnp.float32)          # (Bt, Q, F_H)
        ys.append(y * pl.reciprocal(l, approx=True))

    # Assemble all heads and apply the fused W_V*O diagonal once, in f32.
    ycat = jnp.concatenate(ys, axis=-1) * wvo       # (Bt, Q, F) f32

    if flat_out:
        # Lane-dense store: one (Bt, 1, Q*F) slab with Q*F >= 128 lanes.
        out_ref[...] = ycat.reshape(bt, 1, q_len * F).astype(out_ref.dtype)
    else:
        out_ref[...] = ycat.astype(out_ref.dtype)


def _device_kind():
    try:
        return jax.devices()[0].device_kind.lower()
    except Exception:
        return ""


def _num_tensorcores():
    kind = _device_kind()
    return 2 if ("v7" in kind or "7x" in kind) else 1


def _vmem_limit_bytes():
    """Per-generation VMEM budget: ~3/4 of physical, capped at 48 MiB on v7x."""
    kind = _device_kind()
    cap = None
    try:
        info = pltpu.get_tpu_info()
        for name in ("vmem_capacity_bytes", "vmem_size_bytes"):
            cap = getattr(info, name, None)
            if cap:
                break
    except Exception:
        cap = None
    if not cap:
        cap = (128 if ("v5" in kind or "v6" in kind) else 64) * 1024 * 1024
    limit = (int(cap) * 3) // 4
    if "v7" in kind or "7x" in kind:
        limit = min(limit, 48 * 1024 * 1024)        # v7x: 64 MiB physical per TC
    return int(min(limit, 100 * 1024 * 1024))


def _pad_lanes(width):
    return ((width + _LANE - 1) // _LANE) * _LANE


def _choose_block_b(batch, q_len, k_len, in_itemsize, out_itemsize,
                    vmem_limit, flat_out):
    """VMEM-budget-driven batch block.

    Counts the 4x lane padding of the 32-wide feature dims, double-buffered
    input/output tiles and the f32 softmax intermediates, then caps block_b so
    there are >= 4 grid steps per TensorCore (when B allows) for pipelining.
    """
    in_bytes = 2 * in_itemsize * (q_len * _pad_lanes(D)
                                  + k_len * _pad_lanes(D)
                                  + k_len * _pad_lanes(F))
    if flat_out:
        out_bytes = 2 * out_itemsize * _pad_lanes(q_len * F)
    else:
        out_bytes = 2 * out_itemsize * q_len * _pad_lanes(F)
    work_bytes = 4 * (2 * q_len * _pad_lanes(k_len) + q_len * _pad_lanes(F))
    per_b = in_bytes + out_bytes + work_bytes
    budget = vmem_limit // 2                        # headroom for compiler scratch
    bb = max(1, min(batch, budget // max(per_b, 1)))
    min_steps = min(batch, 4 * _num_tensorcores())
    bb = min(bb, max(1, batch // max(min_steps, 1)))
    while batch % bb:
        bb -= 1
    return bb


def attention_layer(x_q, x_k, x_v, W_Q, W_K, W_V, O, *,
                    block_b=None, input_buffer_count=None):
    """Pallas implementation of AttentionLayer.forward (mask=None).

    Call eagerly (not inside an outer jit) so the lane-dense / fallback output
    layout selection below can catch lowering errors at the pallas_call
    boundary.
    """
    B, q_len, d = x_q.shape
    k_len = x_k.shape[1]
    assert d == D and x_k.shape[2] == D and x_v.shape[2] == F
    assert D == F  # the fused (2, D) scales constant packs both diagonals

    # Fused diagonal constants (single tiny input instead of four parameters).
    wq_d = jnp.einsum('hdd->hd', W_Q).reshape(D)
    wk_d = jnp.einsum('hdd->hd', W_K).reshape(D)
    wv_d = jnp.einsum('hff->hf', W_V).reshape(F)
    wqk = (wq_d * wk_d / math.sqrt(float(D_H))).reshape(1, D)
    wvo = (wv_d * jnp.diagonal(O)).reshape(1, F)
    scales = jnp.concatenate([wqk, wvo], axis=0).astype(jnp.float32)   # (2, D)

    vmem_limit = _vmem_limit_bytes()
    try_flat = (q_len * F) % _LANE == 0             # lane-dense out needs a lane multiple

    if block_b is None:
        block_b = _choose_block_b(B, q_len, k_len, x_q.dtype.itemsize,
                                  x_q.dtype.itemsize, vmem_limit, try_flat)
    block_b = max(1, min(block_b, B))
    while B % block_b:
        block_b -= 1
    grid = (B // block_b,)

    def _x_spec(seq, width):
        kwargs = {}
        if input_buffer_count is not None:          # optional deeper pipelining
            kwargs["pipeline_mode"] = pl.Buffered(input_buffer_count)
        return pl.BlockSpec((block_b, seq, width), lambda b: (b, 0, 0), **kwargs)

    in_specs = [
        pl.BlockSpec((2, D), lambda b: (0, 0)),     # fused scales
        _x_spec(q_len, D),                          # X_Q
        _x_spec(k_len, D),                          # X_K
        _x_spec(k_len, F),                          # X_V
    ]
    compiler_params = pltpu.CompilerParams(
        dimension_semantics=("parallel",),
        vmem_limit_bytes=vmem_limit,
    )

    def _run(flat_out):
        if flat_out:
            out_shape = jax.ShapeDtypeStruct((B, 1, q_len * F), x_q.dtype)
            out_spec = pl.BlockSpec((block_b, 1, q_len * F), lambda b: (b, 0, 0))
        else:
            out_shape = jax.ShapeDtypeStruct((B, q_len, F), x_q.dtype)
            out_spec = pl.BlockSpec((block_b, q_len, F), lambda b: (b, 0, 0))
        grid_spec = pltpu.PrefetchScalarGridSpec(
            num_scalar_prefetch=0,
            grid=grid,
            in_specs=in_specs,
            out_specs=out_spec,
        )
        fn = pl.pallas_call(
            functools.partial(attention_kernel, flat_out=flat_out),
            out_shape=out_shape,
            grid_spec=grid_spec,
            compiler_params=compiler_params,
        )
        return fn(scales, x_q, x_k, x_v)

    if try_flat:
        try:
            # Lane-dense (Q*F-wide) stores: biggest single lever per the review.
            return _run(True).reshape(B, q_len, F)
        except Exception:
            # Minor-dims-merging relayout rejected by this toolchain; fall back
            # to the proven 32-lane-wide output layout.
            pass
    return _run(False)


def reference_forward(x_q, x_k, x_v, W_Q, W_K, W_V, O):
    """Pure-JAX reproduction of the PyTorch forward (for verification)."""
    B, Q, _ = x_q.shape
    Xq = x_q.reshape(B, Q, H, D_H)
    Xk = x_k.reshape(B, -1, H, D_H)
    Xv = x_v.reshape(B, -1, H, F_H)
    wq_d = jnp.einsum('hdd->hd', W_Q)
    wk_d = jnp.einsum('hdd->hd', W_K)
    wv_d = jnp.einsum('hff->hf', W_V)
    scores = jnp.einsum('bqhd,hd,bkhd,hd->bhqk', Xq, wq_d, Xk, wk_d)
    scores = scores / jnp.sqrt(jnp.float32(D_H))
    P = jax.nn.softmax(scores, axis=3)
    Y = jnp.einsum('bhqk,bkhf,hf->bqhf', P, Xv, wv_d)
    Y = Y.reshape(B, Q, F)
    return Y * jnp.diagonal(O)[None, None, :]


def kaiming_normal(key, shape):
    # kaiming_normal_ default: fan_in = prod(shape[1:]), gain = sqrt(2)
    fan_in = 1
    for s in shape[1:]:
        fan_in *= s
    std = math.sqrt(2.0 / fan_in)
    return std * jax.random.normal(key, shape, dtype=jnp.float32)


if __name__ == "__main__":
    key = jax.random.PRNGKey(0)
    k_wq, k_wk, k_wv, k_o, k_q, k_k, k_v = jax.random.split(key, 7)

    # Deterministic parameter init (shapes from __init__).
    W_Q = kaiming_normal(k_wq, (H, D_H, D_H))
    W_K = kaiming_normal(k_wk, (H, D_H, D_H))
    W_V = kaiming_normal(k_wv, (H, F_H, F_H))
    O = kaiming_normal(k_o, (F, F))

    # Small example inputs: batch=2, seq=8, hidden D=F=32.
    B, Q_LEN, K_LEN = 2, 8, 8
    x_q = jax.random.normal(k_q, (B, Q_LEN, D), dtype=jnp.float32)
    x_k = jax.random.normal(k_k, (B, K_LEN, D), dtype=jnp.float32)
    x_v = jax.random.normal(k_v, (B, K_LEN, F), dtype=jnp.float32)

    out = attention_layer(x_q, x_k, x_v, W_Q, W_K, W_V, O)
    out = jax.block_until_ready(out)

    ref = reference_forward(x_q, x_k, x_v, W_Q, W_K, W_V, O)
    assert out.shape == (B, Q_LEN, F)
    # Tolerance accounts for the EUP approximate reciprocal in the softmax
    # normalization and the folded-scale rounding order.
    assert jnp.allclose(out, ref, atol=2e-3, rtol=2e-3), "mismatch vs reference"

    print("KERNEL_OK")
</pallas_src>

<mosaic_0001>
module attributes {stable_mosaic.version = 11 : i64} {
  func.func @attention_kernel(%arg0: i32, %arg1: memref<2x32xf32, #tpu.memory_space<vmem>>, %arg2: memref<1x8x32xf32, #tpu.memory_space<vmem>>, %arg3: memref<1x8x32xf32, #tpu.memory_space<vmem>>, %arg4: memref<1x8x32xf32, #tpu.memory_space<vmem>>, %arg5: memref<1x1x256xf32, #tpu.memory_space<vmem>>) attributes {dimension_semantics = [#tpu.dimension_semantics<parallel>], iteration_bounds = array<i64: 2>, scalar_prefetch = 0 : i64, scratch_operands = 0 : i64, tpu.core_type = #tpu.core_type<tc>, window_params = [{pipeline_mode = #tpu.pipeline_mode<synchronous>, transform_indices = @transform_0, window_bounds = array<i64: 2, 32>}, {transform_indices = @transform_1, window_bounds = array<i64: 1, 8, 32>}, {transform_indices = @transform_2, window_bounds = array<i64: 1, 8, 32>}, {transform_indices = @transform_3, window_bounds = array<i64: 1, 8, 32>}, {transform_indices = @transform_4, window_bounds = array<i64: 1, 1, 256>}]} {
    %c0 = arith.constant 0 : index
    %c0_0 = arith.constant 0 : index
    %0 = vector.load %arg1[%c0, %c0_0] : memref<2x32xf32, #tpu.memory_space<vmem>>, vector<2x32xf32>
    %1 = vector.extract_strided_slice %0 {offsets = [0, 0], sizes = [1, 32], strides = [1, 1]} : vector<2x32xf32> to vector<1x32xf32>
    %2 = vector.shape_cast %1 : vector<1x32xf32> to vector<32xf32>
    %3 = vector.shape_cast %2 : vector<32xf32> to vector<1x1x32xf32>
    %4 = vector.extract_strided_slice %0 {offsets = [1, 0], sizes = [1, 32], strides = [1, 1]} : vector<2x32xf32> to vector<1x32xf32>
    %5 = vector.shape_cast %4 : vector<1x32xf32> to vector<32xf32>
    %6 = vector.shape_cast %5 : vector<32xf32> to vector<1x1x32xf32>
    %c0_1 = arith.constant 0 : index
    %c0_2 = arith.constant 0 : index
    %c0_3 = arith.constant 0 : index
    %7 = vector.load %arg2[%c0_1, %c0_2, %c0_3] : memref<1x8x32xf32, #tpu.memory_space<vmem>>, vector<1x8x32xf32>
    %c0_4 = arith.constant 0 : index
    %c0_5 = arith.constant 0 : index
    %c0_6 = arith.constant 0 : index
    %8 = vector.load %arg3[%c0_4, %c0_5, %c0_6] : memref<1x8x32xf32, #tpu.memory_space<vmem>>, vector<1x8x32xf32>
    %c0_7 = arith.constant 0 : index
    %c0_8 = arith.constant 0 : index
    %c0_9 = arith.constant 0 : index
    %9 = vector.load %arg4[%c0_7, %c0_8, %c0_9] : memref<1x8x32xf32, #tpu.memory_space<vmem>>, vector<1x8x32xf32>
    %10 = vector.broadcast %3 : vector<1x1x32xf32> to vector<1x8x32xf32>
    %11 = arith.mulf %7, %10 : vector<1x8x32xf32>
    %12 = vector.extract_strided_slice %11 {offsets = [0, 0, 0], sizes = [1, 8, 8], strides = [1, 1, 1]} : vector<1x8x32xf32> to vector<1x8x8xf32>
    %13 = vector.extract_strided_slice %8 {offsets = [0, 0, 0], sizes = [1, 8, 8], strides = [1, 1, 1]} : vector<1x8x32xf32> to vector<1x8x8xf32>
    %14 = vector.extract_strided_slice %9 {offsets = [0, 0, 0], sizes = [1, 8, 8], strides = [1, 1, 1]} : vector<1x8x32xf32> to vector<1x8x8xf32>
    "tpu.trace_start"() <{level = 10 : i32, message = "bqd,bkd->bqk"}> : () -> ()
    %cst = arith.constant dense<0.000000e+00> : vector<1x8x8xf32>
    %15 = tpu.matmul %12, %13, %cst {dimension_numbers = #tpu.dot_dimension_numbers<[2], [2], [1], [1], [0, 0, 0, 1, 1, 1], [0], [0]>} : vector<1x8x8xf32>, vector<1x8x8xf32>, vector<1x8x8xf32> -> vector<1x8x8xf32>
    "tpu.trace_stop"() : () -> ()
    %cst_10 = arith.constant dense<0xFF800000> : vector<1x8xf32>
    %16 = vector.multi_reduction <maximumf>, %15, %cst_10 [2] : vector<1x8x8xf32> to vector<1x8xf32>
    %17 = vector.shape_cast %16 : vector<1x8xf32> to vector<1x8x1xf32>
    %18 = vector.broadcast %17 : vector<1x8x1xf32> to vector<1x8x8xf32>
    %19 = arith.subf %15, %18 : vector<1x8x8xf32>
    %20 = math.exp %19 : vector<1x8x8xf32>
    %cst_11 = arith.constant dense<0.000000e+00> : vector<1x8xf32>
    %21 = vector.multi_reduction <add>, %20, %cst_11 [2] : vector<1x8x8xf32> to vector<1x8xf32>
    %22 = vector.shape_cast %21 : vector<1x8xf32> to vector<1x8x1xf32>
    "tpu.trace_start"() <{level = 10 : i32, message = "bqk,bkf->bqf"}> : () -> ()
    %cst_12 = arith.constant dense<0.000000e+00> : vector<1x8x8xf32>
    %23 = tpu.matmul %20, %14, %cst_12 {dimension_numbers = #tpu.dot_dimension_numbers<[2], [1], [1], [2], [0, 0, 0, 1, 1, 2], [0], [0]>} : vector<1x8x8xf32>, vector<1x8x8xf32>, vector<1x8x8xf32> -> vector<1x8x8xf32>
    "tpu.trace_stop"() : () -> ()
    %24 = tpu.reciprocal %22 {approx = true} : vector<1x8x1xf32> -> vector<1x8x1xf32>
    %25 = vector.broadcast %24 : vector<1x8x1xf32> to vector<1x8x8xf32>
    %26 = arith.mulf %23, %25 : vector<1x8x8xf32>
    %27 = vector.extract_strided_slice %11 {offsets = [0, 0, 8], sizes = [1, 8, 8], strides = [1, 1, 1]} : vector<1x8x32xf32> to vector<1x8x8xf32>
    %28 = vector.extract_strided_slice %8 {offsets = [0, 0, 8], sizes = [1, 8, 8], strides = [1, 1, 1]} : vector<1x8x32xf32> to vector<1x8x8xf32>
    %29 = vector.extract_strided_slice %9 {offsets = [0, 0, 8], sizes = [1, 8, 8], strides = [1, 1, 1]} : vector<1x8x32xf32> to vector<1x8x8xf32>
    "tpu.trace_start"() <{level = 10 : i32, message = "bqd,bkd->bqk"}> : () -> ()
    %cst_13 = arith.constant dense<0.000000e+00> : vector<1x8x8xf32>
    %30 = tpu.matmul %27, %28, %cst_13 {dimension_numbers = #tpu.dot_dimension_numbers<[2], [2], [1], [1], [0, 0, 0, 1, 1, 1], [0], [0]>} : vector<1x8x8xf32>, vector<1x8x8xf32>, vector<1x8x8xf32> -> vector<1x8x8xf32>
    "tpu.trace_stop"() : () -> ()
    %cst_14 = arith.constant dense<0xFF800000> : vector<1x8xf32>
    %31 = vector.multi_reduction <maximumf>, %30, %cst_14 [2] : vector<1x8x8xf32> to vector<1x8xf32>
    %32 = vector.shape_cast %31 : vector<1x8xf32> to vector<1x8x1xf32>
    %33 = vector.broadcast %32 : vector<1x8x1xf32> to vector<1x8x8xf32>
    %34 = arith.subf %30, %33 : vector<1x8x8xf32>
    %35 = math.exp %34 : vector<1x8x8xf32>
    %cst_15 = arith.constant dense<0.000000e+00> : vector<1x8xf32>
    %36 = vector.multi_reduction <add>, %35, %cst_15 [2] : vector<1x8x8xf32> to vector<1x8xf32>
    %37 = vector.shape_cast %36 : vector<1x8xf32> to vector<1x8x1xf32>
    "tpu.trace_start"() <{level = 10 : i32, message = "bqk,bkf->bqf"}> : () -> ()
    %cst_16 = arith.constant dense<0.000000e+00> : vector<1x8x8xf32>
    %38 = tpu.matmul %35, %29, %cst_16 {dimension_numbers = #tpu.dot_dimension_numbers<[2], [1], [1], [2], [0, 0, 0, 1, 1, 2], [0], [0]>} : vector<1x8x8xf32>, vector<1x8x8xf32>, vector<1x8x8xf32> -> vector<1x8x8xf32>
    "tpu.trace_stop"() : () -> ()
    %39 = tpu.reciprocal %37 {approx = true} : vector<1x8x1xf32> -> vector<1x8x1xf32>
    %40 = vector.broadcast %39 : vector<1x8x1xf32> to vector<1x8x8xf32>
    %41 = arith.mulf %38, %40 : vector<1x8x8xf32>
    %42 = vector.extract_strided_slice %11 {offsets = [0, 0, 16], sizes = [1, 8, 8], strides = [1, 1, 1]} : vector<1x8x32xf32> to vector<1x8x8xf32>
    %43 = vector.extract_strided_slice %8 {offsets = [0, 0, 16], sizes = [1, 8, 8], strides = [1, 1, 1]} : vector<1x8x32xf32> to vector<1x8x8xf32>
    %44 = vector.extract_strided_slice %9 {offsets = [0, 0, 16], sizes = [1, 8, 8], strides = [1, 1, 1]} : vector<1x8x32xf32> to vector<1x8x8xf32>
    "tpu.trace_start"() <{level = 10 : i32, message = "bqd,bkd->bqk"}> : () -> ()
    %cst_17 = arith.constant dense<0.000000e+00> : vector<1x8x8xf32>
    %45 = tpu.matmul %42, %43, %cst_17 {dimension_numbers = #tpu.dot_dimension_numbers<[2], [2], [1], [1], [0, 0, 0, 1, 1, 1], [0], [0]>} : vector<1x8x8xf32>, vector<1x8x8xf32>, vector<1x8x8xf32> -> vector<1x8x8xf32>
    "tpu.trace_stop"() : () -> ()
    %cst_18 = arith.constant dense<0xFF800000> : vector<1x8xf32>
    %46 = vector.multi_reduction <maximumf>, %45, %cst_18 [2] : vector<1x8x8xf32> to vector<1x8xf32>
    %47 = vector.shape_cast %46 : vector<1x8xf32> to vector<1x8x1xf32>
    %48 = vector.broadcast %47 : vector<1x8x1xf32> to vector<1x8x8xf32>
    %49 = arith.subf %45, %48 : vector<1x8x8xf32>
    %50 = math.exp %49 : vector<1x8x8xf32>
    %cst_19 = arith.constant dense<0.000000e+00> : vector<1x8xf32>
    %51 = vector.multi_reduction <add>, %50, %cst_19 [2] : vector<1x8x8xf32> to vector<1x8xf32>
    %52 = vector.shape_cast %51 : vector<1x8xf32> to vector<1x8x1xf32>
    "tpu.trace_start"() <{level = 10 : i32, message = "bqk,bkf->bqf"}> : () -> ()
    %cst_20 = arith.constant dense<0.000000e+00> : vector<1x8x8xf32>
    %53 = tpu.matmul %50, %44, %cst_20 {dimension_numbers = #tpu.dot_dimension_numbers<[2], [1], [1], [2], [0, 0, 0, 1, 1, 2], [0], [0]>} : vector<1x8x8xf32>, vector<1x8x8xf32>, vector<1x8x8xf32> -> vector<1x8x8xf32>
    "tpu.trace_stop"() : () -> ()
    %54 = tpu.reciprocal %52 {approx = true} : vector<1x8x1xf32> -> vector<1x8x1xf32>
    %55 = vector.broadcast %54 : vector<1x8x1xf32> to vector<1x8x8xf32>
    %56 = arith.mulf %53, %55 : vector<1x8x8xf32>
    %57 = vector.extract_strided_slice %11 {offsets = [0, 0, 24], sizes = [1, 8, 8], strides = [1, 1, 1]} : vector<1x8x32xf32> to vector<1x8x8xf32>
    %58 = vector.extract_strided_slice %8 {offsets = [0, 0, 24], sizes = [1, 8, 8], strides = [1, 1, 1]} : vector<1x8x32xf32> to vector<1x8x8xf32>
    %59 = vector.extract_strided_slice %9 {offsets = [0, 0, 24], sizes = [1, 8, 8], strides = [1, 1, 1]} : vector<1x8x32xf32> to vector<1x8x8xf32>
    "tpu.trace_start"() <{level = 10 : i32, message = "bqd,bkd->bqk"}> : () -> ()
    %cst_21 = arith.constant dense<0.000000e+00> : vector<1x8x8xf32>
    %60 = tpu.matmul %57, %58, %cst_21 {dimension_numbers = #tpu.dot_dimension_numbers<[2], [2], [1], [1], [0, 0, 0, 1, 1, 1], [0], [0]>} : vector<1x8x8xf32>, vector<1x8x8xf32>, vector<1x8x8xf32> -> vector<1x8x8xf32>
    "tpu.trace_stop"() : () -> ()
    %cst_22 = arith.constant dense<0xFF800000> : vector<1x8xf32>
    %61 = vector.multi_reduction <maximumf>, %60, %cst_22 [2] : vector<1x8x8xf32> to vector<1x8xf32>
    %62 = vector.shape_cast %61 : vector<1x8xf32> to vector<1x8x1xf32>
    %63 = vector.broadcast %62 : vector<1x8x1xf32> to vector<1x8x8xf32>
    %64 = arith.subf %60, %63 : vector<1x8x8xf32>
    %65 = math.exp %64 : vector<1x8x8xf32>
    %cst_23 = arith.constant dense<0.000000e+00> : vector<1x8xf32>
    %66 = vector.multi_reduction <add>, %65, %cst_23 [2] : vector<1x8x8xf32> to vector<1x8xf32>
    %67 = vector.shape_cast %66 : vector<1x8xf32> to vector<1x8x1xf32>
    "tpu.trace_start"() <{level = 10 : i32, message = "bqk,bkf->bqf"}> : () -> ()
    %cst_24 = arith.constant dense<0.000000e+00> : vector<1x8x8xf32>
    %68 = tpu.matmul %65, %59, %cst_24 {dimension_numbers = #tpu.dot_dimension_numbers<[2], [1], [1], [2], [0, 0, 0, 1, 1, 2], [0], [0]>} : vector<1x8x8xf32>, vector<1x8x8xf32>, vector<1x8x8xf32> -> vector<1x8x8xf32>
    "tpu.trace_stop"() : () -> ()
    %69 = tpu.reciprocal %67 {approx = true} : vector<1x8x1xf32> -> vector<1x8x1xf32>
    %70 = vector.broadcast %69 : vector<1x8x1xf32> to vector<1x8x8xf32>
    %71 = arith.mulf %68, %70 : vector<1x8x8xf32>
    %72 = tpu.concatenate %26, %41, %56, %71 in 2 : vector<1x8x8xf32>, vector<1x8x8xf32>, vector<1x8x8xf32>, vector<1x8x8xf32> -> vector<1x8x32xf32>
    %73 = vector.broadcast %6 : vector<1x1x32xf32> to vector<1x8x32xf32>
    %74 = arith.mulf %72, %73 : vector<1x8x32xf32>
    %75 = vector.shape_cast %74 : vector<1x8x32xf32> to vector<1x1x256xf32>
    %c0_25 = arith.constant 0 : index
    %c0_26 = arith.constant 0 : index
    %c0_27 = arith.constant 0 : index
    %76 = vector.load %arg5[%c0_25, %c0_26, %c0_27] : memref<1x1x256xf32, #tpu.memory_space<vmem>>, vector<1x1x256xf32>
    tpu.vector_store %arg5[%c0_25, %c0_26, %c0_27], %75 {strides = array<i32>} : memref<1x1x256xf32, #tpu.memory_space<vmem>>, vector<1x1x256xf32>,
    return
  }
  func.func @transform_0(%arg0: i32) -> (i32, i32) {
    %c0_i32 = arith.constant 0 : i32
    %c0_i32_0 = arith.constant 0 : i32
    %c0_i32_1 = arith.constant 0 : i32
    return %c0_i32, %c0_i32_0 : i32, i32
  }
  func.func @transform_1(%arg0: i32) -> (i32, i32, i32) {
    %c0_i32 = arith.constant 0 : i32
    %c0_i32_0 = arith.constant 0 : i32
    %c0_i32_1 = arith.constant 0 : i32
    return %arg0, %c0_i32, %c0_i32_0 : i32, i32, i32
  }
  func.func @transform_2(%arg0: i32) -> (i32, i32, i32) {
    %c0_i32 = arith.constant 0 : i32
    %c0_i32_0 = arith.constant 0 : i32
    %c0_i32_1 = arith.constant 0 : i32
    return %arg0, %c0_i32, %c0_i32_0 : i32, i32, i32
  }
  func.func @transform_3(%arg0: i32) -> (i32, i32, i32) {
    %c0_i32 = arith.constant 0 : i32
    %c0_i32_0 = arith.constant 0 : i32
    %c0_i32_1 = arith.constant 0 : i32
    return %arg0, %c0_i32, %c0_i32_0 : i32, i32, i32
  }
  func.func @transform_4(%arg0: i32) -> (i32, i32, i32) {
    %c0_i32 = arith.constant 0 : i32
    %c0_i32_0 = arith.constant 0 : i32
    %c0_i32_1 = arith.constant 0 : i32
    return %arg0, %c0_i32, %c0_i32_0 : i32, i32, i32
  }
}

module attributes {stable_mosaic.version = 11 : i64} {
  func.func @attention_kernel(%arg0: i32, %arg1: memref<2x32xf32, #tpu.memory_space<vmem>>, %arg2: memref<1x8x32xf32, #tpu.memory_space<vmem>>, %arg3: memref<1x8x32xf32, #tpu.memory_space<vmem>>, %arg4: memref<1x8x32xf32, #tpu.memory_space<vmem>>, %arg5: memref<1x8x32xf32, #tpu.memory_space<vmem>>) attributes {dimension_semantics = [#tpu.dimension_semantics<parallel>], iteration_bounds = array<i64: 2>, scalar_prefetch = 0 : i64, scratch_operands = 0 : i64, tpu.core_type = #tpu.core_type<tc>, window_params = [{pipeline_mode = #tpu.pipeline_mode<synchronous>, transform_indices = @transform_0, window_bounds = array<i64: 2, 32>}, {transform_indices = @transform_1, window_bounds = array<i64: 1, 8, 32>}, {transform_indices = @transform_2, window_bounds = array<i64: 1, 8, 32>}, {transform_indices = @transform_3, window_bounds = array<i64: 1, 8, 32>}, {transform_indices = @transform_4, window_bounds = array<i64: 1, 8, 32>}]} {
    %c0 = arith.constant 0 : index
    %c0_0 = arith.constant 0 : index
    %0 = vector.load %arg1[%c0, %c0_0] : memref<2x32xf32, #tpu.memory_space<vmem>>, vector<2x32xf32>
    %1 = vector.extract_strided_slice %0 {offsets = [0, 0], sizes = [1, 32], strides = [1, 1]} : vector<2x32xf32> to vector<1x32xf32>
    %2 = vector.shape_cast %1 : vector<1x32xf32> to vector<32xf32>
    %3 = vector.shape_cast %2 : vector<32xf32> to vector<1x1x32xf32>
    %4 = vector.extract_strided_slice %0 {offsets = [1, 0], sizes = [1, 32], strides = [1, 1]} : vector<2x32xf32> to vector<1x32xf32>
    %5 = vector.shape_cast %4 : vector<1x32xf32> to vector<32xf32>
    %6 = vector.shape_cast %5 : vector<32xf32> to vector<1x1x32xf32>
    %c0_1 = arith.constant 0 : index
    %c0_2 = arith.constant 0 : index
    %c0_3 = arith.constant 0 : index
    %7 = vector.load %arg2[%c0_1, %c0_2, %c0_3] : memref<1x8x32xf32, #tpu.memory_space<vmem>>, vector<1x8x32xf32>
    %c0_4 = arith.constant 0 : index
    %c0_5 = arith.constant 0 : index
    %c0_6 = arith.constant 0 : index
    %8 = vector.load %arg3[%c0_4, %c0_5, %c0_6] : memref<1x8x32xf32, #tpu.memory_space<vmem>>, vector<1x8x32xf32>
    %c0_7 = arith.constant 0 : index
    %c0_8 = arith.constant 0 : index
    %c0_9 = arith.constant 0 : index
    %9 = vector.load %arg4[%c0_7, %c0_8, %c0_9] : memref<1x8x32xf32, #tpu.memory_space<vmem>>, vector<1x8x32xf32>
    %10 = vector.broadcast %3 : vector<1x1x32xf32> to vector<1x8x32xf32>
    %11 = arith.mulf %7, %10 : vector<1x8x32xf32>
    %12 = vector.extract_strided_slice %11 {offsets = [0, 0, 0], sizes = [1, 8, 8], strides = [1, 1, 1]} : vector<1x8x32xf32> to vector<1x8x8xf32>
    %13 = vector.extract_strided_slice %8 {offsets = [0, 0, 0], sizes = [1, 8, 8], strides = [1, 1, 1]} : vector<1x8x32xf32> to vector<1x8x8xf32>
    %14 = vector.extract_strided_slice %9 {offsets = [0, 0, 0], sizes = [1, 8, 8], strides = [1, 1, 1]} : vector<1x8x32xf32> to vector<1x8x8xf32>
    "tpu.trace_start"() <{level = 10 : i32, message = "bqd,bkd->bqk"}> : () -> ()
    %cst = arith.constant dense<0.000000e+00> : vector<1x8x8xf32>
    %15 = tpu.matmul %12, %13, %cst {dimension_numbers = #tpu.dot_dimension_numbers<[2], [2], [1], [1], [0, 0, 0, 1, 1, 1], [0], [0]>} : vector<1x8x8xf32>, vector<1x8x8xf32>, vector<1x8x8xf32> -> vector<1x8x8xf32>
    "tpu.trace_stop"() : () -> ()
    %cst_10 = arith.constant dense<0xFF800000> : vector<1x8xf32>
    %16 = vector.multi_reduction <maximumf>, %15, %cst_10 [2] : vector<1x8x8xf32> to vector<1x8xf32>
    %17 = vector.shape_cast %16 : vector<1x8xf32> to vector<1x8x1xf32>
    %18 = vector.broadcast %17 : vector<1x8x1xf32> to vector<1x8x8xf32>
    %19 = arith.subf %15, %18 : vector<1x8x8xf32>
    %20 = math.exp %19 : vector<1x8x8xf32>
    %cst_11 = arith.constant dense<0.000000e+00> : vector<1x8xf32>
    %21 = vector.multi_reduction <add>, %20, %cst_11 [2] : vector<1x8x8xf32> to vector<1x8xf32>
    %22 = vector.shape_cast %21 : vector<1x8xf32> to vector<1x8x1xf32>
    "tpu.trace_start"() <{level = 10 : i32, message = "bqk,bkf->bqf"}> : () -> ()
    %cst_12 = arith.constant dense<0.000000e+00> : vector<1x8x8xf32>
    %23 = tpu.matmul %20, %14, %cst_12 {dimension_numbers = #tpu.dot_dimension_numbers<[2], [1], [1], [2], [0, 0, 0, 1, 1, 2], [0], [0]>} : vector<1x8x8xf32>, vector<1x8x8xf32>, vector<1x8x8xf32> -> vector<1x8x8xf32>
    "tpu.trace_stop"() : () -> ()
    %24 = tpu.reciprocal %22 {approx = true} : vector<1x8x1xf32> -> vector<1x8x1xf32>
    %25 = vector.broadcast %24 : vector<1x8x1xf32> to vector<1x8x8xf32>
    %26 = arith.mulf %23, %25 : vector<1x8x8xf32>
    %27 = vector.extract_strided_slice %11 {offsets = [0, 0, 8], sizes = [1, 8, 8], strides = [1, 1, 1]} : vector<1x8x32xf32> to vector<1x8x8xf32>
    %28 = vector.extract_strided_slice %8 {offsets = [0, 0, 8], sizes = [1, 8, 8], strides = [1, 1, 1]} : vector<1x8x32xf32> to vector<1x8x8xf32>
    %29 = vector.extract_strided_slice %9 {offsets = [0, 0, 8], sizes = [1, 8, 8], strides = [1, 1, 1]} : vector<1x8x32xf32> to vector<1x8x8xf32>
    "tpu.trace_start"() <{level = 10 : i32, message = "bqd,bkd->bqk"}> : () -> ()
    %cst_13 = arith.constant dense<0.000000e+00> : vector<1x8x8xf32>
    %30 = tpu.matmul %27, %28, %cst_13 {dimension_numbers = #tpu.dot_dimension_numbers<[2], [2], [1], [1], [0, 0, 0, 1, 1, 1], [0], [0]>} : vector<1x8x8xf32>, vector<1x8x8xf32>, vector<1x8x8xf32> -> vector<1x8x8xf32>
    "tpu.trace_stop"() : () -> ()
    %cst_14 = arith.constant dense<0xFF800000> : vector<1x8xf32>
    %31 = vector.multi_reduction <maximumf>, %30, %cst_14 [2] : vector<1x8x8xf32> to vector<1x8xf32>
    %32 = vector.shape_cast %31 : vector<1x8xf32> to vector<1x8x1xf32>
    %33 = vector.broadcast %32 : vector<1x8x1xf32> to vector<1x8x8xf32>
    %34 = arith.subf %30, %33 : vector<1x8x8xf32>
    %35 = math.exp %34 : vector<1x8x8xf32>
    %cst_15 = arith.constant dense<0.000000e+00> : vector<1x8xf32>
    %36 = vector.multi_reduction <add>, %35, %cst_15 [2] : vector<1x8x8xf32> to vector<1x8xf32>
    %37 = vector.shape_cast %36 : vector<1x8xf32> to vector<1x8x1xf32>
    "tpu.trace_start"() <{level = 10 : i32, message = "bqk,bkf->bqf"}> : () -> ()
    %cst_16 = arith.constant dense<0.000000e+00> : vector<1x8x8xf32>
    %38 = tpu.matmul %35, %29, %cst_16 {dimension_numbers = #tpu.dot_dimension_numbers<[2], [1], [1], [2], [0, 0, 0, 1, 1, 2], [0], [0]>} : vector<1x8x8xf32>, vector<1x8x8xf32>, vector<1x8x8xf32> -> vector<1x8x8xf32>
    "tpu.trace_stop"() : () -> ()
    %39 = tpu.reciprocal %37 {approx = true} : vector<1x8x1xf32> -> vector<1x8x1xf32>
    %40 = vector.broadcast %39 : vector<1x8x1xf32> to vector<1x8x8xf32>
    %41 = arith.mulf %38, %40 : vector<1x8x8xf32>
    %42 = vector.extract_strided_slice %11 {offsets = [0, 0, 16], sizes = [1, 8, 8], strides = [1, 1, 1]} : vector<1x8x32xf32> to vector<1x8x8xf32>
    %43 = vector.extract_strided_slice %8 {offsets = [0, 0, 16], sizes = [1, 8, 8], strides = [1, 1, 1]} : vector<1x8x32xf32> to vector<1x8x8xf32>
    %44 = vector.extract_strided_slice %9 {offsets = [0, 0, 16], sizes = [1, 8, 8], strides = [1, 1, 1]} : vector<1x8x32xf32> to vector<1x8x8xf32>
    "tpu.trace_start"() <{level = 10 : i32, message = "bqd,bkd->bqk"}> : () -> ()
    %cst_17 = arith.constant dense<0.000000e+00> : vector<1x8x8xf32>
    %45 = tpu.matmul %42, %43, %cst_17 {dimension_numbers = #tpu.dot_dimension_numbers<[2], [2], [1], [1], [0, 0, 0, 1, 1, 1], [0], [0]>} : vector<1x8x8xf32>, vector<1x8x8xf32>, vector<1x8x8xf32> -> vector<1x8x8xf32>
    "tpu.trace_stop"() : () -> ()
    %cst_18 = arith.constant dense<0xFF800000> : vector<1x8xf32>
    %46 = vector.multi_reduction <maximumf>, %45, %cst_18 [2] : vector<1x8x8xf32> to vector<1x8xf32>
    %47 = vector.shape_cast %46 : vector<1x8xf32> to vector<1x8x1xf32>
    %48 = vector.broadcast %47 : vector<1x8x1xf32> to vector<1x8x8xf32>
    %49 = arith.subf %45, %48 : vector<1x8x8xf32>
    %50 = math.exp %49 : vector<1x8x8xf32>
    %cst_19 = arith.constant dense<0.000000e+00> : vector<1x8xf32>
    %51 = vector.multi_reduction <add>, %50, %cst_19 [2] : vector<1x8x8xf32> to vector<1x8xf32>
    %52 = vector.shape_cast %51 : vector<1x8xf32> to vector<1x8x1xf32>
    "tpu.trace_start"() <{level = 10 : i32, message = "bqk,bkf->bqf"}> : () -> ()
    %cst_20 = arith.constant dense<0.000000e+00> : vector<1x8x8xf32>
    %53 = tpu.matmul %50, %44, %cst_20 {dimension_numbers = #tpu.dot_dimension_numbers<[2], [1], [1], [2], [0, 0, 0, 1, 1, 2], [0], [0]>} : vector<1x8x8xf32>, vector<1x8x8xf32>, vector<1x8x8xf32> -> vector<1x8x8xf32>
    "tpu.trace_stop"() : () -> ()
    %54 = tpu.reciprocal %52 {approx = true} : vector<1x8x1xf32> -> vector<1x8x1xf32>
    %55 = vector.broadcast %54 : vector<1x8x1xf32> to vector<1x8x8xf32>
    %56 = arith.mulf %53, %55 : vector<1x8x8xf32>
    %57 = vector.extract_strided_slice %11 {offsets = [0, 0, 24], sizes = [1, 8, 8], strides = [1, 1, 1]} : vector<1x8x32xf32> to vector<1x8x8xf32>
    %58 = vector.extract_strided_slice %8 {offsets = [0, 0, 24], sizes = [1, 8, 8], strides = [1, 1, 1]} : vector<1x8x32xf32> to vector<1x8x8xf32>
    %59 = vector.extract_strided_slice %9 {offsets = [0, 0, 24], sizes = [1, 8, 8], strides = [1, 1, 1]} : vector<1x8x32xf32> to vector<1x8x8xf32>
    "tpu.trace_start"() <{level = 10 : i32, message = "bqd,bkd->bqk"}> : () -> ()
    %cst_21 = arith.constant dense<0.000000e+00> : vector<1x8x8xf32>
    %60 = tpu.matmul %57, %58, %cst_21 {dimension_numbers = #tpu.dot_dimension_numbers<[2], [2], [1], [1], [0, 0, 0, 1, 1, 1], [0], [0]>} : vector<1x8x8xf32>, vector<1x8x8xf32>, vector<1x8x8xf32> -> vector<1x8x8xf32>
    "tpu.trace_stop"() : () -> ()
    %cst_22 = arith.constant dense<0xFF800000> : vector<1x8xf32>
    %61 = vector.multi_reduction <maximumf>, %60, %cst_22 [2] : vector<1x8x8xf32> to vector<1x8xf32>
    %62 = vector.shape_cast %61 : vector<1x8xf32> to vector<1x8x1xf32>
    %63 = vector.broadcast %62 : vector<1x8x1xf32> to vector<1x8x8xf32>
    %64 = arith.subf %60, %63 : vector<1x8x8xf32>
    %65 = math.exp %64 : vector<1x8x8xf32>
    %cst_23 = arith.constant dense<0.000000e+00> : vector<1x8xf32>
    %66 = vector.multi_reduction <add>, %65, %cst_23 [2] : vector<1x8x8xf32> to vector<1x8xf32>
    %67 = vector.shape_cast %66 : vector<1x8xf32> to vector<1x8x1xf32>
    "tpu.trace_start"() <{level = 10 : i32, message = "bqk,bkf->bqf"}> : () -> ()
    %cst_24 = arith.constant dense<0.000000e+00> : vector<1x8x8xf32>
    %68 = tpu.matmul %65, %59, %cst_24 {dimension_numbers = #tpu.dot_dimension_numbers<[2], [1], [1], [2], [0, 0, 0, 1, 1, 2], [0], [0]>} : vector<1x8x8xf32>, vector<1x8x8xf32>, vector<1x8x8xf32> -> vector<1x8x8xf32>
    "tpu.trace_stop"() : () -> ()
    %69 = tpu.reciprocal %67 {approx = true} : vector<1x8x1xf32> -> vector<1x8x1xf32>
    %70 = vector.broadcast %69 : vector<1x8x1xf32> to vector<1x8x8xf32>
    %71 = arith.mulf %68, %70 : vector<1x8x8xf32>
    %72 = tpu.concatenate %26, %41, %56, %71 in 2 : vector<1x8x8xf32>, vector<1x8x8xf32>, vector<1x8x8xf32>, vector<1x8x8xf32> -> vector<1x8x32xf32>
    %73 = vector.broadcast %6 : vector<1x1x32xf32> to vector<1x8x32xf32>
    %74 = arith.mulf %72, %73 : vector<1x8x32xf32>
    %c0_25 = arith.constant 0 : index
    %c0_26 = arith.constant 0 : index
    %c0_27 = arith.constant 0 : index
    %75 = vector.load %arg5[%c0_25, %c0_26, %c0_27] : memref<1x8x32xf32, #tpu.memory_space<vmem>>, vector<1x8x32xf32>
    tpu.vector_store %arg5[%c0_25, %c0_26, %c0_27], %74 {strides = array<i32>} : memref<1x8x32xf32, #tpu.memory_space<vmem>>, vector<1x8x32xf32>,
    return
  }
  func.func @transform_0(%arg0: i32) -> (i32, i32) {
    %c0_i32 = arith.constant 0 : i32
    %c0_i32_0 = arith.constant 0 : i32
    %c0_i32_1 = arith.constant 0 : i32
    return %c0_i32, %c0_i32_0 : i32, i32
  }
  func.func @transform_1(%arg0: i32) -> (i32, i32, i32) {
    %c0_i32 = arith.constant 0 : i32
    %c0_i32_0 = arith.constant 0 : i32
    %c0_i32_1 = arith.constant 0 : i32
    return %arg0, %c0_i32, %c0_i32_0 : i32, i32, i32
  }
  func.func @transform_2(%arg0: i32) -> (i32, i32, i32) {
    %c0_i32 = arith.constant 0 : i32
    %c0_i32_0 = arith.constant 0 : i32
    %c0_i32_1 = arith.constant 0 : i32
    return %arg0, %c0_i32, %c0_i32_0 : i32, i32, i32
  }
  func.func @transform_3(%arg0: i32) -> (i32, i32, i32) {
    %c0_i32 = arith.constant 0 : i32
    %c0_i32_0 = arith.constant 0 : i32
    %c0_i32_1 = arith.constant 0 : i32
    return %arg0, %c0_i32, %c0_i32_0 : i32, i32, i32
  }
  func.func @transform_4(%arg0: i32) -> (i32, i32, i32) {
    %c0_i32 = arith.constant 0 : i32
    %c0_i32_0 = arith.constant 0 : i32
    %c0_i32_1 = arith.constant 0 : i32
    return %arg0, %c0_i32, %c0_i32_0 : i32, i32, i32
  }
}

</mosaic_0001>

<bundles_post_ra>
// kernel: tpu_custom_call.1
= control target key start
LH: loop header
LB: loop body
LE: loop exit
PB: predicated region body
PF: predicated region fallthrough
CT: control target
= control target key end

     0   :  { %s2014_s0 = inlined_call_operand.hbm [shape: f32[2,32], index: 0, kind: input, shape index: {}]   ;;  %s2015_s1 = inlined_call_operand.hbm [shape: f32[2,8,32], index: 1, kind: input, shape index: {}]   ;;  %s2016_s2 = inlined_call_operand.hbm [shape: f32[2,8,32], index: 2, kind: input, shape index: {}]   ;;  %s2017_s3 = inlined_call_operand.hbm [shape: f32[2,8,32], index: 3, kind: input, shape index: {}]   ;;  %s2018_s4 = inlined_call_operand.hbm [shape: f32[2,1,256], index: 4, kind: output, shape index: {}]  }
   0x1   :  { %2032 = sst [smem:[#allocation17_spill]] %s2015_s1 }
   0x2   :  { %2033 = sst [smem:[#allocation18_spill]] %s2016_s2 }
   0x3   :  { %9 = vsyncpa [#allocation3], 0 }
   0x4   :  { %10 = vsyncpa [#allocation6], 0 }
   0x5   :  { %12 = vsyncpa [#allocation6 + $0x1], 0 }
   0x6   :  { %13 = vsyncpa [#allocation9], 0 }
   0x7   :  { %15 = vsyncpa [#allocation9 + $0x1], 0 }
   0x8   :  { %16 = vsyncpa [#allocation4], 0 }
   0x9   :  { %18 = vsyncpa [#allocation4 + $0x1], 0  ;;  %s1655_s15 = smov 0   ;;  %s1657_s16 = smov 0  }
   0xa   :  { %s1659_s17 = smov 0   ;;  %s1661_s18 = smov 0  }
   0xb LB: > { %s1676_s19 = sadd.s32 1, %s1609_s18   ;;  %s52_s20 = sadd.s32 1, %s1605_s17  ;;  %s1609_s18 = sphi %s1661_s18, %s2058_s18   ;;  %s1605_s17 = sphi %s1659_s17, %s2062_s17   ;;  %s1601_s16 = sphi %s1657_s16, %s2061_s16   ;;  %s1597_s15 = sphi %s1655_s15, %s2060_s15  }
   0xc   : > { %2034 = sst [smem:[#allocation15_spill]] %s1676_s19  ;;  %s49_s21 = ssub.s32 %s1609_s18, %s1676_s19 }
   0xd   : > { %p2019_p0 = scmp.ne.s32.totalorder %s1605_s17, %s1601_s16  ;;  %p50_p1 = scmp.eq.s32.totalorder %s49_s21, 0 }
   0xe   : > { %p60_p2 = scmp.eq.s32.totalorder %s1609_s18, 0  ;;  %p1351_p4 = scmp.lt.s32.totalorder %s1609_s18, 2 }
   0xf   : > { %s1687_s22 = scalar_select %p50_p1, %s1605_s17, %s52_s20  }
  0x10   : > { %p61_p5 = por %p60_p2, %p2019_p0  ;;  %s178_s23 = sand.u32 1, %s1609_s18  }
  0x11   : > { %2035 = sst [smem:[#allocation16_spill]] %s1687_s22  ;;  %s2020_s24 = sand.u32 1, %s1605_s17  }
  0x12   : > { %s1696_s25 = sshll.u32 %s2020_s24, 3  ;;  %s1699_s26 = sshll.u32 %s1609_s18, 7 }
  0x13   : > { %s2036_s1 = sld [smem:[#allocation17_spill]]  ;;  %s182_s30 = scalar_lea.vmem [#allocation5], %s1696_s25 }
  0x14   : > { %s189_s5 = sshll.u32 %s182_s30, 4  ;;  %p1708_p6 = pnand %p1351_p4, %p61_p5  ;;  %s1712_s5 = int_to_ptr.vmem [resolvable:$true] %s189_s5 }
  0x15   : > { %s1714_s7 = scalar_lea.sflag [#allocation6], %s178_s23 }
  0x16   : > { %s2037_s6 = scalar_select %p1708_p6, 1, 0 }
  0x17   : > { %p1720_p8 = pneg %p1708_p6 }
  0x19   : > { %s1705_s29 = scalar_lea.hbm %s2036_s1, %s1699_s26  ;;  %s1422_s12 = scalar_lea.hbm %s2036_s1, 256 }
  0x1a   : > { %s1417_s8 = scalar_lea.hbm %s1705_s29, 128  ;;  %p1423_p11 = scmp.lt.u32.totalorder %s1705_s29, %s2036_s1 }
  0x1b   : > { %p1418_p7 = scmp.ne.s32.totalorder %s1705_s29, %s1417_s8  ;;  %p1424_p12 = scmp.lt.u32.totalorder %s1422_s12, %s1417_s8 }
  0x1c   : > { %s2038_s9 = scalar_select %p1720_p8, 1, 0 }
  0x1d   : > { %p1420_p9 = pnand %p1720_p8, %p1418_p7  ;;  %p1425_p13 = por %p1424_p12, %p1423_p11 }
  0x1e   : > { %p1426_p1 = scmp.lt.u32.totalorder %s1417_s8, %s1705_s29 }
  0x1f   : > { %p1421_p10 = pneg %p1420_p9 }
  0x20   : > { %p1427_p2 = por %p1426_p1, %p1425_p13 }
  0x22   : > { %p1428_p4 = pnand %p1427_p2, %p1421_p10 }
  0x24   : > { %1431 = shalt.err (!%p1428_p4)
}
  0x25   : > { %s1432_s20 = scalar_lea.vmem %s1712_s5, 128  ;;  %s1611_s21 = smov [#allocation5]  }
  0x26   : > { %p1433_p5 = scmp.ne.s32.totalorder %s1712_s5, %s1432_s20  ;;  %s1437_s23 = sshll.u32 %s1611_s21, 4  ;;  %s1438_s23 = int_to_ptr.vmem [resolvable:$false] %s1437_s23 }
  0x27   : > { %s1439_s27 = scalar_lea.vmem %s1438_s23, 256  ;;  %p1440_p3 = scmp.lt.s32.totalorder %s1712_s5, %s1438_s23 }
  0x28   : > { %p1435_p7 = pnand %p1433_p5, %p1720_p8  ;;  %p1441_p0 = scmp.lt.s32.totalorder %s1439_s27, %s1432_s20 }
  0x2a   : > { %p1436_p9 = pneg %p1435_p7  ;;  %p1442_p11 = por %p1441_p0, %p1440_p3 }
  0x2c   : > { %p1443_p12 = pnand %p1442_p11, %p1436_p9 }
  0x2e   : > { %1446 = shalt.err (!%p1443_p12)
}
  0x2f   : > { %1339 = dma.hbm_to_vmem [thread:$0]  (!%p1708_p6), %s1705_s29, 128, %s1712_s5, %s1714_s7  }
  0x30   : > { %s1745_s28 = sadd.s32 4294967295, %s1609_s18   ;;  %s1230_s30 = sadd.s32 4294967294, %s1609_s18  }
  0x31   : > { %p65_p0 = scmp.ne.s32.totalorder %s1601_s16, %s1597_s15  ;;  %p2022_p3 = scmp.eq.s32.totalorder %s1745_s28, 0 }
  0x32   : > { %p141_p10 = scmp.eq.s32.totalorder %s1745_s28, 1  ;;  %p147_p13 = scmp.eq.s32.totalorder %s1230_s30, 1 }
  0x33   : > { %p1754_p1 = por %p2022_p3, %p65_p0  ;;  %p1231_p2 = scmp.ge.s32.totalorder %s1609_s18, 1 }
  0x34   : > { %p2040_p4 = scmp.ne.s32.totalorder %s1605_s17, %s1601_s16  ;;  %p1766_p7 = por %p147_p13, %p65_p0 }
  0x35   : > { %s2039_s8 = scalar_select %p1754_p1, 1, 0 }
  0x36   : > { %p1762_p5 = por %p141_p10, %p2040_p4  ;;  %p154_p9 = scmp.lt.s32.totalorder %s1609_s18, 3 }
  0x37   : > { %s2042_s5 = scalar_select %p1766_p7, 1, 0 }
  0x38   : > { %s2041_s29 = scalar_select %p1762_p5, 1, 0 }
  0x39   : > { %p1771_p11 = pnand %p1231_p2, %p154_p9  ;;  %s1612_s11 = smov [#allocation2]  }
  0x3a   : > { %s167_s12 = sshll.u32 %s1612_s11, 4  ;;  %s2044_s2 = sld [smem:[#allocation18_spill]]  ;;  %s1775_s12 = int_to_ptr.vmem [resolvable:$true] %s167_s12 }
  0x3b   : > { %s2043_s10 = scalar_select %p1771_p11, 1, 0 }
  0x3c   : > { %p1332_p12 = pneg %p1771_p11  ;;  %s200_s21 = scalar_lea.vmem [#allocation7], %s1696_s25 }
  0x3d   : > { %s207_s23 = sshll.u32 %s200_s21, 4  ;;  %s208_s23 = int_to_ptr.vmem [resolvable:$true] %s207_s23 }
  0x3e   : > { %p1788_p0 = pnand %p1332_p12, %p2022_p3 }
  0x40   : > { %s1781_s20 = scalar_lea.hbm %s2044_s2, %s1699_s26  ;;  %s1452_s14 = scalar_lea.hbm %s2044_s2, 256 }
  0x41   : > { %s2045_s27 = scalar_select %p1788_p0, 1, 0 }
  0x42   : > { %s1447_s30 = scalar_lea.hbm %s1781_s20, 128  ;;  %p1453_p4 = scmp.lt.u32.totalorder %s1781_s20, %s2044_s2 }
  0x43   : > { %p1448_p10 = scmp.ne.s32.totalorder %s1781_s20, %s1447_s30  ;;  %p1454_p9 = scmp.lt.u32.totalorder %s1452_s14, %s1447_s30 }
  0x44   : > { %p1456_p5 = scmp.lt.u32.totalorder %s1447_s30, %s1781_s20 }
  0x45   : > { %p1450_p13 = pnand %p1448_p10, %p1720_p8  ;;  %p1455_p7 = por %p1454_p9, %p1453_p4 }
  0x47   : > { %p1451_p2 = pneg %p1450_p13  ;;  %p1457_p12 = por %p1456_p5, %p1455_p7 }
  0x49   : > { %p1458_p3 = pnand %p1457_p12, %p1451_p2 }
  0x4b   : > { %1461 = shalt.err (!%p1458_p3)
}
  0x4c   : > { %s1462_s21 = scalar_lea.vmem %s208_s23, 128  ;;  %s1613_s22 = smov [#allocation7]  }
  0x4d   : > { %p1463_p1 = scmp.ne.s32.totalorder %s208_s23, %s1462_s21  ;;  %s1467_s19 = sshll.u32 %s1613_s22, 4  ;;  %s1468_s19 = int_to_ptr.vmem [resolvable:$false] %s1467_s19 }
  0x4e   : > { %s1469_s11 = scalar_lea.vmem %s1468_s19, 256  ;;  %p1470_p11 = scmp.lt.s32.totalorder %s208_s23, %s1468_s19 }
  0x4f   : > { %p1465_p10 = pnand %p1463_p1, %p1720_p8  ;;  %p1471_p0 = scmp.lt.s32.totalorder %s1469_s11, %s1462_s21 }
  0x51   : > { %p1466_p13 = pneg %p1465_p10  ;;  %p1472_p6 = por %p1471_p0, %p1470_p11 }
  0x53   : > { %p1473_p4 = pnand %p1472_p6, %p1466_p13 }
  0x55   : > { %1476 = shalt.err (!%p1473_p4)
}
  0x56   : > { %p2046_p9 = scmp.ne.s32.totalorder %s2037_s6, 0  ;;  %s1814_s30 = scalar_lea.hbm %s2017_s3, %s1699_s26 }
  0x57   : > { %s1477_s19 = scalar_lea.hbm %s2014_s0, 32  ;;  %p2047_p3 = scmp.ne.s32.totalorder %s2045_s27, 0 }
  0x58   : > { %1342 = dma.hbm_to_vmem [thread:$0]  (!%p2046_p9), %s1781_s20, 128, %s208_s23, %s1714_s7  }
  0x59   : > { %p1478_p6 = scmp.ne.s32.totalorder %s2014_s0, %s1477_s19  ;;  %p1479_p1 = pneg %p2047_p3 }
  0x5a   : > { %p1484_p11 = scmp.lt.u32.totalorder %s1477_s19, %s2014_s0 }
  0x5b   : > { %p1480_p5 = pnand %p1479_p1, %p1478_p6 }
  0x5d   : > { %p1481_p7 = pneg %p1480_p5 }
  0x5f   : > { %p1486_p0 = pnand %p1484_p11, %p1481_p7 }
  0x61   : > { %1489 = shalt.err (!%p1486_p0)
}
  0x62   : > { %s1490_s26 = scalar_lea.vmem %s1775_s12, 32  ;;  %p1498_p13 = scmp.lt.s32.totalorder %s1775_s12, %s1775_s12 }
  0x63   : > { %p1491_p2 = scmp.ne.s32.totalorder %s1775_s12, %s1490_s26  ;;  %p1499_p4 = scmp.lt.s32.totalorder %s1490_s26, %s1490_s26 }
  0x65   : > { %p1493_p12 = pnand %p1491_p2, %p1479_p1  ;;  %p1500_p9 = por %p1499_p4, %p1498_p13 }
  0x67   : > { %p1494_p10 = pneg %p1493_p12 }
  0x69   : > { %p1501_p8 = pnand %p1500_p9, %p1494_p10 }
  0x6b   : > { %1504 = shalt.err (!%p1501_p8)
}
  0x6c   : > { %1335 = dma.hbm_to_vmem [thread:$0]  (!%p2047_p3), %s2014_s0, 32, %s1775_s12, [#allocation3]  }
  0x6d   : > { %s218_s20 = scalar_lea.vmem [#allocation8], %s1696_s25  ;;  %s2048_s1 = sand.u32 1, %s1605_s17  }
  0x6e   : > { %s225_s23 = sshll.u32 %s218_s20, 4  ;;  %s215_s24 = scalar_lea.sflag [#allocation9], %s2048_s1  ;;  %s226_s23 = int_to_ptr.vmem [resolvable:$true] %s225_s23 }
  0x6f   : > { %s1505_s22 = scalar_lea.hbm %s1814_s30, 128  ;;  %p2049_p9 = scmp.ne.s32.totalorder %s2038_s9, 0 }
  0x70   : > { %p1506_p8 = scmp.ne.s32.totalorder %s1814_s30, %s1505_s22  ;;  %s1510_s19 = scalar_lea.hbm %s2017_s3, 256 }
  0x71   : > { %p1511_p5 = scmp.lt.u32.totalorder %s1814_s30, %s2017_s3  ;;  %p1512_p7 = scmp.lt.u32.totalorder %s1510_s19, %s1505_s22 }
  0x72   : > { %p1508_p6 = pnand %p1506_p8, %p2049_p9  ;;  %p1514_p11 = scmp.lt.u32.totalorder %s1505_s22, %s1814_s30 }
  0x73   : > { %p1513_p3 = por %p1512_p7, %p1511_p5 }
  0x74   : > { %p1509_p1 = pneg %p1508_p6 }
  0x75   : > { %p1515_p0 = por %p1514_p11, %p1513_p3 }
  0x77   : > { %p1516_p2 = pnand %p1515_p0, %p1509_p1 }
  0x79   : > { %1519 = shalt.err (!%p1516_p2)
}
  0x7a   : > { %s1520_s25 = scalar_lea.vmem %s226_s23, 128  ;;  %s1614_s12 = smov [#allocation8]  }
  0x7b   : > { %p1521_p12 = scmp.ne.s32.totalorder %s226_s23, %s1520_s25  ;;  %s1525_s11 = sshll.u32 %s1614_s12, 4  ;;  %s1526_s11 = int_to_ptr.vmem [resolvable:$false] %s1525_s11 }
  0x7c   : > { %s1527_s26 = scalar_lea.vmem %s1526_s11, 256  ;;  %p1528_p4 = scmp.lt.s32.totalorder %s226_s23, %s1526_s11 }
  0x7d   : > { %p1523_p10 = pnand %p1521_p12, %p2049_p9  ;;  %p1529_p8 = scmp.lt.s32.totalorder %s1527_s26, %s1520_s25 }
  0x7f   : > { %p1524_p13 = pneg %p1523_p10  ;;  %p1530_p6 = por %p1529_p8, %p1528_p4 }
  0x81   : > { %p1531_p5 = pnand %p1530_p6, %p1524_p13 }
  0x83   : > { %1534 = shalt.err (!%p1531_p5)
}
  0x84   : > { %p2050_p7 = scmp.ne.s32.totalorder %s2037_s6, 0  ;;  %p2051_p1 = scmp.ne.s32.totalorder %s2043_s10, 0 }
  0x85   : > { %p2052_p3 = scmp.eq.s32.totalorder (!%p2051_p1), %s1745_s28, 0 }
  0x86   : > { %1345 = dma.hbm_to_vmem [thread:$0]  (!%p2050_p7), %s1814_s30, 128, %s226_s23, %s215_s24  }
  0x87   : > { %234 = sbr.rel (%p2051_p1) target bundleno = 1442 (0x5a2), region = 36 }
  0x8e   : > { %1580 = dma.done.wait (%p2052_p3), [#allocation3], 32   ;;  %p2053_p9 = pmov %p2052_p3 }
  0x8f   : > { %s240_s9 = sand.u32 1, %s1745_s28   ;;  %s1865_s2 = sand.u32 1, %s1601_s16  }
  0x90   : > { %1582 = vsyncadd (%p2053_p9), [#allocation3], 4294967264  ;;  %s1868_s7 = sshll.u32 %s1865_s2, 3  ;;  %s241_s6 = scalar_lea.sflag [#allocation6], %s240_s9 }
  0x91   : > { %s244_s30 = scalar_lea.vmem [#allocation5], %s1868_s7  ;;  %p2054_p11 = scmp.ne.s32.totalorder %s2039_s8, 0 }
  0x93   : > { %1584 = dma.done.wait (%p2054_p11), %s241_s6, 256  }
  0x94   : > { %1586 = vsyncadd (%p2054_p11), %s241_s6, 4294967040  ;;  %s253_s10 = scalar_lea.vmem [#allocation7], %s1868_s7  ;;  %s259_s20 = scalar_lea.sflag [#allocation9], %s1865_s2 }
  0x95   : > { %s262_s23 = scalar_lea.vmem [#allocation8], %s1868_s7 }
  0x96   : > { %1588 = dma.done.wait (%p2054_p11), %s259_s20, 128  }
  0x97   : > { %1590 = vsyncadd (%p2054_p11), %s259_s20, 4294967168  ;;  %v301_v0 = vlaneseq  ;;  %v1615_v1 = vmov 0.0   ;;  %vm1616_vm0 = vmmov 0   ;;  %vm306_vm1 = vcmask 64512   ;;  %v299_v4 = vld [vmem:[%s253_s10] sm:$0xff]  ;;  %v298_v6 = vld [vmem:[%s244_s30] sm:$0xff] }
  0x98   : > { %1280 = vmatprep.subr.mxu0 %v1615_v1  ;;  %1282 = vmatprep.mubr.msk.f32.mxu0 %vm1616_vm0, %v1615_v1  ;;  %v1892_v5 = vld [vmem:[#allocation2] sm:$0x3]  ;;  %s1617_s8 = smov 120   ;;  %s1618_s1 = smov 112   ;;  %v300_v12 = vld [vmem:[%s262_s23] sm:$0xff]  ;;  %vm976_vm2 = vcmask 130048  }
  0x99   : > { %v1886_v2 = vshrl.u32 %v301_v0, 7  ;;  %1285 = vmatprep.subr.mxu1 %v1615_v1  ;;  %1287 = vmatprep.mubr.msk.f32.mxu1 %vm1616_vm0, %v1615_v1  ;;  %s1619_s24 = smov 104   ;;  %s1620_s22 = smov 8   ;;  %vm978_vm3 = vcmask 195584   ;;  %vm1058_vm4 = vcmask 261120   ;;  %vm1060_vm5 = vcmask 523264  }
  0x9a   : > { %1281 = vmatpush3.xpose.msk.msra.mxu0 %vm306_vm1, %v299_v4  ;;  %1286 = vmatpush3.msra.mxu1 %v300_v12  ;;  %s1621_s27 = smov 16   ;;  %s1622_s13 = smov 24   ;;  %vm1062_vm6 = vcmask 785408   ;;  %vm1087_vm7 = vcmp.lt.s32.totalorder %v301_v0, 256 }
  0x9b   : > { %v303_v3 = vsub.s32 0, %v1886_v2  ;;  %1295 = vmatprep.subr.mxu0 %v1615_v1  ;;  %1290 = vmatprep.subr.mxu1 %v1615_v1  ;;  %s1625_s19 = smov 32   ;;  %s1626_s14 = smov 64  }
  0x9c   : > { %s1627_s21 = smov 96   ;;  %s1245_s25 = sshll.u32 %s1865_s2, 1 }
  0x9d   : > { %v304_v7 = vrot.slane %v1892_v5, %v303_v3  ;;  %s1263_s12 = sshll.u32 %s1745_s28, 5  ;;  %s296_s11 = scalar_lea.vmem [#allocation10], %s1245_s25 }
  0x9e   : > { %s1105_s26 = sshll.u32 %s296_s11, 4  ;;  %s1970_s6 = scalar_lea.hbm %s2018_s4, %s1263_s12  ;;  %s1972_s26 = int_to_ptr.vmem [resolvable:$true] %s1105_s26 }
  0x9f   : > { %v305_v8 = vmul.f32 %v304_v7, %v298_v6  ;;  %s1091_s30 = scalar_lea.sflag [#allocation4], %s1865_s2  ;;  %s1535_s10 = scalar_lea.vmem %s1972_s26, 32 }
  0xa0   : > { %p1536_p0 = scmp.ne.s32.totalorder %s1972_s26, %s1535_s10  ;;  %p2055_p2 = scmp.ne.s32.totalorder %s2041_s29, 0 }
  0xa1   : > { %1283 = vmatmul.mubr.msk.f32.vlgmr.msra.gmra.mrb[0].mxu0 %vm306_vm1, %v305_v8  ;;  %467 = vrot.lane.b32.xlu1 %v305_v8, %s1617_s8  ;;  %s1629_s28 = smov [#allocation10]  }
  0xa2   : > { %1297 = vmatprep.mubr.msk.f32.mxu0 %vm1616_vm0, %v1615_v1  ;;  %p1537_p12 = pnand %p1536_p0, %p2055_p2  ;;  %s1539_s20 = sshll.u32 %s1629_s28, 4  ;;  %s1540_s20 = int_to_ptr.vmem [resolvable:$false] %s1539_s20 }
  0xa3   : > { %s1541_s23 = scalar_lea.vmem %s1540_s20, 64  ;;  %p1542_p13 = scmp.lt.s32.totalorder %s1972_s26, %s1540_s20 }
  0xa4   : > { %p1538_p10 = pneg %p1537_p12  ;;  %p1543_p4 = scmp.lt.s32.totalorder %s1541_s23, %s1535_s10 }
  0xa5   : > { %635 = vrot.lane.b32.xlu1 %v299_v4, %s1618_s1 }
  0xa6   : > { %p1544_p8 = por %p1543_p4, %p1542_p13 }
  0xa8   : > { %p1545_p6 = pnand %p1544_p8, %p1538_p10 }
  0xa9   : > { %633 = vrot.lane.b32.xlu1 %v305_v8, %s1618_s1 }
  0xad   : > { %800 = vrot.lane.b32.xlu1 %v299_v4, %s1619_s24 }
  0xb1   : > { %798 = vrot.lane.b32.xlu1 %v305_v8, %s1619_s24 }
 0x113   : > { %v468_v16 = vpop.permute.xlu1 %467 }
 0x117   : > { %v636_v17 = vpop.permute.xlu1 %635 }
 0x11b   : > { %v634_v20 = vpop.permute.xlu1 %633 }
 0x11f   : > { %v801_v21 = vpop.permute.xlu1 %800 }
 0x123   : > { %v799_v22 = vpop.permute.xlu1 %798 }
 0x174   : > { %v379_v9 = vpop.f32.mrb[0].mxu0 }
 0x175   : > { %v1284_v10 = vpop.f32.mrb[1].mxu0  ;;  %v383_v11 = vsel %vm306_vm1, %v379_v9, -inf }
 0x176   : > { %384 = vmax.xlane.f32.xlu0 %v383_v11 }
 0x18c   : > { %469 = vrot.lane.b32.xlu0 %v299_v4, %s1617_s8 }
 0x203   : > { %v385_v13 = vpop.xlane.xlu0 %384 }
 0x204   : > { %v386_v14 = vsub.f32 %v379_v9, %v385_v13  ;;  %v1623_v9 = vmov 1983009808   ;;  %v1624_v13 = vmov 1934713408  }
 0x205   : > { %v987_v10 = vunpack.c.l.s4 %v1623_v9 }
 0x206   : > { %v387_v15 = vmul.f32 1.442695, %v386_v14  ;;  %v1002_v14 = vunpack.c.l.s4 %v1624_v13 }
 0x207   : > { %v470_v18 = vpop.permute.xlu0 %469 }
 0x208   : > { %1401 = vpow2.f32 %v387_v15 }
 0x212   : > { %v1910_v19 = vpop.eup %1401 }
 0x213   : > { %1288 = vmatmul.mubr.msk.f32.vlgmr.msra.gmra.mrb[0].mxu1 %vm306_vm1, %v1910_v19  ;;  %v389_v52 = vsel %vm306_vm1, %v1910_v19, 0.0 }
 0x214   : > { %1291 = vmatpush3.xpose.msk.msra.mxu1 %vm306_vm1, %v470_v18  ;;  %1292 = vmatprep.mubr.msk.f32.mxu1 %vm1616_vm0, %v1615_v1 }
 0x215   : > { %1300 = vmatprep.subr.mxu1 %v1615_v1 }
 0x217   : > { %1293 = vmatmul.mubr.msk.f32.vlgmr.msra.gmra.mrb[2].mxu1 %vm306_vm1, %v468_v16  ;;  %v988_v16 = vunpack.c.0.s8 %v987_v10 }
 0x218   : > { %1301 = vmatpush3.xpose.msk.msra.mxu1 %vm306_vm1, %v636_v17  ;;  %1302 = vmatprep.mubr.msk.f32.mxu1 %vm1616_vm0, %v1615_v1 }
 0x219   : > { %1310 = vmatprep.subr.mxu1 %v1615_v1 }
 0x21b   : > { %1303 = vmatmul.mubr.msk.f32.vlgmr.msra.gmra.mrb[4].mxu1 %vm306_vm1, %v634_v20  ;;  %v1003_v20 = vunpack.c.0.s8 %v1002_v14 }
 0x21c   : > { %1311 = vmatpush3.xpose.msk.msra.mxu1 %vm306_vm1, %v801_v21  ;;  %1312 = vmatprep.mubr.msk.f32.mxu1 %vm1616_vm0, %v1615_v1 }
 0x21f   : > { %1313 = vmatmul.mubr.msk.f32.vlgmr.msra.gmra.mrb[6].mxu1 %vm306_vm1, %v799_v22 }
 0x2e6   : > { %v1928_v23 = vpop.f32.mrb[0].mxu1 }
 0x2e7   : > { %v1289_v24 = vpop.f32.mrb[1].mxu1 }
 0x2e8   : > { %v991_v24 = vsub.s32 %v988_v16, %v1886_v2 }
 0x2ea   : > { %v541_v25 = vpop.f32.mrb[2].mxu1 }
 0x2eb   : > { %v1294_v26 = vpop.f32.mrb[3].mxu1  ;;  %v545_v27 = vsel %vm306_vm1, %v541_v25, -inf }
 0x2ec   : > { %546 = vmax.xlane.f32.xlu1 %v545_v27 }
 0x2ee   : > { %v707_v28 = vpop.f32.mrb[4].mxu1 }
 0x2ef   : > { %v711_v29 = vsel %vm306_vm1, %v707_v28, -inf  ;;  %v1304_v30 = vpop.f32.mrb[5].mxu1 }
 0x2f0   : > { %712 = vmax.xlane.f32.xlu0 %v711_v29 }
 0x2f2   : > { %v872_v31 = vpop.f32.mrb[6].mxu1 }
 0x2f3   : > { %v1314_v32 = vpop.f32.mrb[7].mxu1  ;;  %v876_v33 = vsel %vm306_vm1, %v872_v31, -inf }
 0x2fd   : > { %720 = vrot.lane.b32.xlu1 %v300_v12, %s1618_s1 }
 0x306   : > { %555 = vrot.lane.b32.xlu0 %v300_v12, %s1617_s8 }
 0x321   : > { %877 = vmax.xlane.f32.xlu1 %v876_v33 }
 0x332   : > { %885 = vrot.lane.b32.xlu1 %v300_v12, %s1619_s24  ;;  %v982_v12 = vsub.s32 1, %v1886_v2 }
 0x334   : > { %v983_v19 = vrot.slane %v1892_v5, %v982_v12 }
 0x379   : > { %v547_v34 = vpop.xlane.xlu1 %546 }
 0x37a   : > { %v548_v35 = vsub.f32 %v541_v25, %v547_v34 }
 0x37c   : > { %v549_v36 = vmul.f32 1.442695, %v548_v35 }
 0x37d   : > { %v713_v37 = vpop.xlane.xlu0 %712  ;;  %v721_v42 = vpop.permute.xlu1 %720 }
 0x37e   : > { %1403 = vpow2.f32 %v549_v36  ;;  %v714_v38 = vsub.f32 %v707_v28, %v713_v37  ;;  %v1006_v28 = vsub.s32 %v1003_v20, %v1886_v2 }
 0x380   : > { %v715_v39 = vmul.f32 1.442695, %v714_v38 }
 0x381   : > { %v556_v40 = vpop.permute.xlu0 %555 }
 0x382   : > { %1405 = vpow2.f32 %v715_v39  ;;  %1296 = vmatpush3.msra.mxu0 %v556_v40 }
 0x383   : > { %1305 = vmatprep.subr.mxu0 %v1615_v1 }
 0x388   : > { %v1404_v41 = vpop.eup %1403 }
 0x389   : > { %1298 = vmatmul.mubr.msk.f32.vlgmr.msra.gmra.mrb[2].mxu0 %vm306_vm1, %v1404_v41  ;;  %v551_v43 = vsel %vm306_vm1, %v1404_v41, 0.0 }
 0x38a   : > { %1306 = vmatpush3.msra.mxu0 %v721_v42  ;;  %552 = vadd.xlane.f32.xlu0 %v551_v43  ;;  %v1628_v42 = vmov 1966171168  }
 0x38b   : > { %1307 = vmatprep.mubr.msk.f32.mxu0 %vm1616_vm0, %v1615_v1  ;;  %1315 = vmatprep.subr.mxu0 %v1615_v1  ;;  %v1071_v43 = vunpack.c.l.s4 %v1628_v42 }
 0x38c   : > { %v1406_v44 = vpop.eup %1405 }
 0x38d   : > { %1308 = vmatmul.mubr.msk.f32.vlgmr.msra.gmra.mrb[4].mxu0 %vm306_vm1, %v1406_v44  ;;  %v717_v45 = vsel %vm306_vm1, %v1406_v44, 0.0 }
 0x38e   : > { %718 = vadd.xlane.f32.xlu1 %v717_v45  ;;  %1317 = vmatprep.mubr.msk.f32.mxu0 %vm1616_vm0, %v1615_v1 }
 0x3ae   : > { %v878_v46 = vpop.xlane.xlu1 %877 }
 0x3af   : > { %v879_v47 = vsub.f32 %v872_v31, %v878_v46  ;;  %v1072_v46 = vunpack.c.0.s8 %v1071_v43 }
 0x3b1   : > { %v880_v48 = vmul.f32 1.442695, %v879_v47 }
 0x3b2   : > { %v886_v49 = vpop.permute.xlu1 %885 }
 0x3b3   : > { %1407 = vpow2.f32 %v880_v48  ;;  %1316 = vmatpush3.msra.mxu0 %v886_v49 }
 0x3bd   : > { %v1408_v50 = vpop.eup %1407 }
 0x3be   : > { %1318 = vmatmul.mubr.msk.f32.vlgmr.msra.gmra.mrb[6].mxu0 %vm306_vm1, %v1408_v50  ;;  %v882_v51 = vsel %vm306_vm1, %v1408_v50, 0.0 }
 0x3bf   : > { %883 = vadd.xlane.f32.xlu0 %v882_v51 }
 0x3c3   : > { %390 = vadd.xlane.f32.xlu0 %v389_v52 }
 0x417   : > { %v553_v53 = vpop.xlane.xlu0 %552 }
 0x418   : > { %1409 = vrcp.f32 %v553_v53 }
 0x41b   : > { %v719_v54 = vpop.xlane.xlu1 %718 }
 0x41c   : > { %1411 = vrcp.f32 %v719_v54 }
 0x422   : > { %v1410_v55 = vpop.eup %1409 }
 0x426   : > { %v1412_v59 = vpop.eup %1411 }
 0x44c   : > { %v884_v63 = vpop.xlane.xlu0 %883 }
 0x44d   : > { %1413 = vrcp.f32 %v884_v63 }
 0x450   : > { %v391_v8 = vpop.xlane.xlu0 %390 }
 0x451   : > { %1415 = vrcp.f32 %v391_v8 }
 0x457   : > { %v1414_v3 = vpop.eup %1413 }
 0x45b   : > { %v1416_v11 = vpop.eup %1415 }
 0x45c   : > { %v627_v56 = vpop.f32.mrb[2].mxu0  ;;  %v466_v17 = vmul.f32 %v1416_v11, %v1928_v23 }
 0x45d   : > { %v632_v57 = vmul.f32 %v1410_v55, %v627_v56  ;;  %v1299_v58 = vpop.f32.mrb[3].mxu0 }
 0x45f   : > { %964 = vrot.lane.b32.xlu1 %v632_v57, %s1620_s22 }
 0x460   : > { %v792_v60 = vpop.f32.mrb[4].mxu0 }
 0x461   : > { %v797_v61 = vmul.f32 %v1412_v59, %v792_v60  ;;  %v1309_v62 = vpop.f32.mrb[5].mxu0 }
 0x463   : > { %968 = vrot.lane.b32.xlu0 %v797_v61, %s1621_s27 }
 0x491   : > { %v957_v4 = vpop.f32.mrb[6].mxu0 }
 0x492   : > { %v962_v6 = vmul.f32 %v1414_v3, %v957_v4  ;;  %v1319_v7 = vpop.f32.mrb[7].mxu0 }
 0x494   : > { %972 = vrot.lane.b32.xlu1 %v962_v6, %s1622_s13 }
 0x4d1   : > { %v965_v15 = vpop.permute.xlu1 %964 }
 0x4d2   : > { %v975_v21 = vsel %vm306_vm1, %v466_v17, %v965_v15 }
 0x4d5   : > { %v969_v18 = vpop.permute.xlu0 %968 }
 0x4d6   : > { %v977_v22 = vsel %vm976_vm2, %v975_v21, %v969_v18 }
 0x506   : > { %v973_v25 = vpop.permute.xlu1 %972 }
 0x507   : > { %v979_v26 = vsel %vm978_vm3, %v977_v22, %v973_v25 }
 0x508   : > { %v984_v27 = vmul.f32 %v983_v19, %v979_v26 }
 0x50a   : > { %v985_v29 = vcombine.high %v984_v27, %v1615_v1  ;;  %v992_v30 = vrot.slane %v984_v27, %v991_v24 }
 0x50c   : > { %v999_v23 = vrot.slane %v985_v29, %v991_v24  ;;  %v1007_v31 = vrot.slane %v992_v30, %v1006_v28  ;;  %v1000_v5 = vcombine.high %v992_v30, %v1615_v1 }
 0x50e   : > { %v1030_v32 = vcombine.high %v1007_v31, %v1615_v1  ;;  %v1022_v33 = vrot.slane %v999_v23, %v1006_v28  ;;  %v1015_v35 = vcombine.high %v999_v23, %v1615_v1  ;;  %v1014_v36 = vrot.slane %v1000_v5, %v1006_v28 }
 0x510   : > { %1035 = vrot.lane.b32.xlu1 %v1030_v32, %s1625_s19  ;;  %v1032_v34 = vcombine.high %v1022_v33, %v1615_v1  ;;  %v1029_v37 = vrot.slane %v1015_v35, %v1006_v28  ;;  %v1031_v38 = vcombine.high %v1014_v36, %v1615_v1 }
 0x512   : > { %1047 = vrot.lane.b32.xlu0 %v1032_v34, %s1625_s19  ;;  %v1033_v39 = vcombine.high %v1029_v37, %v1615_v1  ;;  %v1075_v1 = vsub.s32 %v1072_v46, %v1886_v2 }
 0x514   : > { %1039 = vrot.lane.b32.xlu1 %v1014_v36, %s1626_s14 }
 0x516   : > { %1051 = vrot.lane.b32.xlu0 %v1029_v37, %s1626_s14 }
 0x518   : > { %1043 = vrot.lane.b32.xlu1 %v1031_v38, %s1627_s21 }
 0x51a   : > { %1055 = vrot.lane.b32.xlu0 %v1033_v39, %s1627_s21 }
 0x582   : > { %v1036_v40 = vpop.permute.xlu1 %1035 }
 0x583   : > { %v1059_v48 = vsel %vm1058_vm4, %v1007_v31, %v1036_v40 }
 0x584   : > { %v1048_v41 = vpop.permute.xlu0 %1047 }
 0x585   : > { %v1064_v49 = vsel %vm1058_vm4, %v1022_v33, %v1048_v41 }
 0x586   : > { %v1040_v44 = vpop.permute.xlu1 %1039 }
 0x587   : > { %v1061_v50 = vsel %vm1060_vm5, %v1059_v48, %v1040_v44 }
 0x588   : > { %v1052_v45 = vpop.permute.xlu0 %1051 }
 0x589   : > { %v1065_v51 = vsel %vm1060_vm5, %v1064_v49, %v1052_v45 }
 0x58a   : > { %v1044_v47 = vpop.permute.xlu1 %1043 }
 0x58b   : > { %v1063_v53 = vsel %vm1062_vm6, %v1061_v50, %v1044_v47 }
 0x58c   : > { %v1056_v52 = vpop.permute.xlu0 %1055 }
 0x58d   : > { %v1066_v54 = vsel %vm1062_vm6, %v1065_v51, %v1056_v52 }
 0x58e   : > { %v1069_v55 = vcombine.low %v1063_v53, %v1066_v54 }
 0x590   : > { %v1076_v56 = vrot.slane %v1069_v55, %v1075_v1 }
 0x592   : > { %v1083_v57 = vrot.slane %v1076_v56, %v1075_v1 }
 0x594   : > { %1089 = vst.msk [vmem:[%s296_s11] sm:$0x3] %vm1087_vm7, %v1083_v57 }
 0x595   : > { %1548 = shalt.err (!%p1545_p6)
}
 0x596   : > { %s1549_s2 = scalar_lea.hbm %s1970_s6, 32  ;;  %s1553_s24 = scalar_lea.hbm %s2018_s4, 64 }
 0x597   : > { %p1550_p5 = scmp.ne.s32.totalorder %s1970_s6, %s1549_s2  ;;  %p1554_p3 = scmp.lt.u32.totalorder %s1970_s6, %s2018_s4 }
 0x598   : > { %p1555_p9 = scmp.lt.u32.totalorder %s1553_s24, %s1549_s2  ;;  %p1557_p0 = scmp.lt.u32.totalorder %s1549_s2, %s1970_s6 }
 0x599   : > { %p1551_p7 = pnand %p1550_p5, %p2055_p2 }
 0x59a   : > { %p1556_p11 = por %p1555_p9, %p1554_p3 }
 0x59b   : > { %p1552_p1 = pneg %p1551_p7 }
 0x59c   : > { %p1558_p12 = por %p1557_p0, %p1556_p11 }
 0x59e   : > { %p1559_p10 = pnand %p1558_p12, %p1552_p1 }
 0x5a0   : > { %1562 = shalt.err (!%p1559_p10)
}
 0x5a1   : > { %1330 = dma.vmem_to_hbm [thread:$0]  (%p2055_p2), %s1972_s26, 32, %s1970_s6, %s1091_s30  }
 0x5a2 PF: > { %s1117_s13 = sand.u32 1, %s1597_s15   ;;  %p2056_p13 = scmp.ne.s32.totalorder %s2042_s5, 0 }
 0x5a3   : > { %p2057_p4 = scmp.ge.s32.totalorder %s1609_s18, 2  ;;  %s1118_s19 = scalar_lea.sflag [#allocation4], %s1117_s13 }
 0x5a5   : > { %p1347_p8 = pnand %p2057_p4, %p2056_p13 }
 0x5a7   : > { %1592 = dma.done.wait (!%p1347_p8), %s1118_s19, 32  }
 0x5a8   : > { %1594 = vsyncadd (!%p1347_p8), %s1118_s19, 4294967264  ;;  %s2058_s18 = sld [smem:[#allocation15_spill]]  ;;  %s2059_s14 = sld [smem:[#allocation16_spill]] }
 0x5a9   : > { %s2060_s15 = smov %s1601_s16  ;;  %s2061_s16 = smov %s1605_s17 }
 0x5ae   : > { %p21_p6 = scmp.ge.s32.totalorder %s2058_s18, 4   ;;  %s2062_s17 = smov %s2059_s14 }
 0x5b0   :  { %23 = sbr.rel (!%p21_p6) target bundleno = 11 (0xb), region = 110 }
 0x5b7   :  { %1123 = vsyncpa [#allocation3], 1 }
 0x5b8   :  { %1125 = vsyncpa [#allocation3 + $0x1], 1 }
 0x5b9   :  { %1126 = vsyncpa [#allocation6], 1 }
 0x5ba   :  { %1128 = vsyncpa [#allocation6 + $0x1], 1 }
 0x5bb   :  { %1129 = vsyncpa [#allocation9], 1 }
 0x5bc   :  { %1131 = vsyncpa [#allocation9 + $0x1], 1 }
 0x5bd   :  { %1132 = vsyncpa [#allocation4], 1 }
 0x5be   :  { %1134 = vsyncpa [#allocation4 + $0x1], 1 }

// kernel: tpu_custom_call.1
= control target key start
LH: loop header
LB: loop body
LE: loop exit
PB: predicated region body
PF: predicated region fallthrough
CT: control target
= control target key end

     0   :  { %s1884_s0 = inlined_call_operand.hbm [shape: f32[2,32], index: 0, kind: input, shape index: {}]   ;;  %s1885_s1 = inlined_call_operand.hbm [shape: f32[2,8,32], index: 1, kind: input, shape index: {}]   ;;  %s1886_s2 = inlined_call_operand.hbm [shape: f32[2,8,32], index: 2, kind: input, shape index: {}]   ;;  %s1887_s3 = inlined_call_operand.hbm [shape: f32[2,8,32], index: 3, kind: input, shape index: {}]   ;;  %s1888_s4 = inlined_call_operand.hbm [shape: f32[2,8,32], index: 4, kind: output, shape index: {}]  }
   0x1   :  { %1902 = sst [smem:[#allocation17_spill]] %s1885_s1 }
   0x2   :  { %1903 = sst [smem:[#allocation18_spill]] %s1886_s2 }
   0x3   :  { %9 = vsyncpa [#allocation3], 0 }
   0x4   :  { %10 = vsyncpa [#allocation6], 0 }
   0x5   :  { %12 = vsyncpa [#allocation6 + $0x1], 0 }
   0x6   :  { %13 = vsyncpa [#allocation9], 0 }
   0x7   :  { %15 = vsyncpa [#allocation9 + $0x1], 0 }
   0x8   :  { %16 = vsyncpa [#allocation4], 0 }
   0x9   :  { %18 = vsyncpa [#allocation4 + $0x1], 0  ;;  %s1537_s15 = smov 0   ;;  %s1539_s16 = smov 0  }
   0xa   :  { %s1541_s17 = smov 0   ;;  %s1543_s18 = smov 0  }
   0xb LB: > { %s1558_s19 = sadd.s32 1, %s1497_s18   ;;  %s52_s20 = sadd.s32 1, %s1493_s17  ;;  %s1497_s18 = sphi %s1543_s18, %s1928_s18   ;;  %s1493_s17 = sphi %s1541_s17, %s1932_s17   ;;  %s1489_s16 = sphi %s1539_s16, %s1931_s16   ;;  %s1485_s15 = sphi %s1537_s15, %s1930_s15  }
   0xc   : > { %1904 = sst [smem:[#allocation15_spill]] %s1558_s19  ;;  %s49_s21 = ssub.s32 %s1497_s18, %s1558_s19 }
   0xd   : > { %p1889_p0 = scmp.ne.s32.totalorder %s1493_s17, %s1489_s16  ;;  %p50_p1 = scmp.eq.s32.totalorder %s49_s21, 0 }
   0xe   : > { %p60_p2 = scmp.eq.s32.totalorder %s1497_s18, 0  ;;  %p1245_p4 = scmp.lt.s32.totalorder %s1497_s18, 2 }
   0xf   : > { %s1569_s22 = scalar_select %p50_p1, %s1493_s17, %s52_s20  }
  0x10   : > { %p61_p5 = por %p60_p2, %p1889_p0  ;;  %s178_s23 = sand.u32 1, %s1497_s18  }
  0x11   : > { %1905 = sst [smem:[#allocation16_spill]] %s1569_s22  ;;  %s1890_s24 = sand.u32 1, %s1493_s17  }
  0x12   : > { %s1578_s25 = sshll.u32 %s1890_s24, 3  ;;  %s1581_s26 = sshll.u32 %s1497_s18, 7 }
  0x13   : > { %s1906_s1 = sld [smem:[#allocation17_spill]]  ;;  %s182_s30 = scalar_lea.vmem [#allocation5], %s1578_s25 }
  0x14   : > { %s189_s5 = sshll.u32 %s182_s30, 4  ;;  %p1590_p6 = pnand %p1245_p4, %p61_p5  ;;  %s1594_s5 = int_to_ptr.vmem [resolvable:$true] %s189_s5 }
  0x15   : > { %s1596_s7 = scalar_lea.sflag [#allocation6], %s178_s23 }
  0x16   : > { %s1907_s6 = scalar_select %p1590_p6, 1, 0 }
  0x17   : > { %p1602_p8 = pneg %p1590_p6 }
  0x19   : > { %s1587_s29 = scalar_lea.hbm %s1906_s1, %s1581_s26  ;;  %s1310_s12 = scalar_lea.hbm %s1906_s1, 256 }
  0x1a   : > { %s1305_s8 = scalar_lea.hbm %s1587_s29, 128  ;;  %p1311_p11 = scmp.lt.u32.totalorder %s1587_s29, %s1906_s1 }
  0x1b   : > { %p1306_p7 = scmp.ne.s32.totalorder %s1587_s29, %s1305_s8  ;;  %p1312_p12 = scmp.lt.u32.totalorder %s1310_s12, %s1305_s8 }
  0x1c   : > { %s1908_s9 = scalar_select %p1602_p8, 1, 0 }
  0x1d   : > { %p1308_p9 = pnand %p1602_p8, %p1306_p7  ;;  %p1313_p13 = por %p1312_p12, %p1311_p11 }
  0x1e   : > { %p1314_p1 = scmp.lt.u32.totalorder %s1305_s8, %s1587_s29 }
  0x1f   : > { %p1309_p10 = pneg %p1308_p9 }
  0x20   : > { %p1315_p2 = por %p1314_p1, %p1313_p13 }
  0x22   : > { %p1316_p4 = pnand %p1315_p2, %p1309_p10 }
  0x24   : > { %1319 = shalt.err (!%p1316_p4)
}
  0x25   : > { %s1320_s20 = scalar_lea.vmem %s1594_s5, 128  ;;  %s1499_s21 = smov [#allocation5]  }
  0x26   : > { %p1321_p5 = scmp.ne.s32.totalorder %s1594_s5, %s1320_s20  ;;  %s1325_s23 = sshll.u32 %s1499_s21, 4  ;;  %s1326_s23 = int_to_ptr.vmem [resolvable:$false] %s1325_s23 }
  0x27   : > { %s1327_s27 = scalar_lea.vmem %s1326_s23, 256  ;;  %p1328_p3 = scmp.lt.s32.totalorder %s1594_s5, %s1326_s23 }
  0x28   : > { %p1323_p7 = pnand %p1321_p5, %p1602_p8  ;;  %p1329_p0 = scmp.lt.s32.totalorder %s1327_s27, %s1320_s20 }
  0x2a   : > { %p1324_p9 = pneg %p1323_p7  ;;  %p1330_p11 = por %p1329_p0, %p1328_p3 }
  0x2c   : > { %p1331_p12 = pnand %p1330_p11, %p1324_p9 }
  0x2e   : > { %1334 = shalt.err (!%p1331_p12)
}
  0x2f   : > { %1233 = dma.hbm_to_vmem [thread:$0]  (!%p1590_p6), %s1587_s29, 128, %s1594_s5, %s1596_s7  }
  0x30   : > { %s1627_s28 = sadd.s32 4294967295, %s1497_s18   ;;  %s1126_s30 = sadd.s32 4294967294, %s1497_s18  }
  0x31   : > { %p65_p0 = scmp.ne.s32.totalorder %s1489_s16, %s1485_s15  ;;  %p1892_p3 = scmp.eq.s32.totalorder %s1627_s28, 0 }
  0x32   : > { %p141_p10 = scmp.eq.s32.totalorder %s1627_s28, 1  ;;  %p147_p13 = scmp.eq.s32.totalorder %s1126_s30, 1 }
  0x33   : > { %p1636_p1 = por %p1892_p3, %p65_p0  ;;  %p1127_p2 = scmp.ge.s32.totalorder %s1497_s18, 1 }
  0x34   : > { %p1910_p4 = scmp.ne.s32.totalorder %s1493_s17, %s1489_s16  ;;  %p1648_p7 = por %p147_p13, %p65_p0 }
  0x35   : > { %s1909_s8 = scalar_select %p1636_p1, 1, 0 }
  0x36   : > { %p1644_p5 = por %p141_p10, %p1910_p4  ;;  %p154_p9 = scmp.lt.s32.totalorder %s1497_s18, 3 }
  0x37   : > { %s1912_s5 = scalar_select %p1648_p7, 1, 0 }
  0x38   : > { %s1911_s29 = scalar_select %p1644_p5, 1, 0 }
  0x39   : > { %p1653_p11 = pnand %p1127_p2, %p154_p9  ;;  %s1500_s11 = smov [#allocation2]  }
  0x3a   : > { %s167_s12 = sshll.u32 %s1500_s11, 4  ;;  %s1914_s2 = sld [smem:[#allocation18_spill]]  ;;  %s1657_s12 = int_to_ptr.vmem [resolvable:$true] %s167_s12 }
  0x3b   : > { %s1913_s10 = scalar_select %p1653_p11, 1, 0 }
  0x3c   : > { %p1226_p12 = pneg %p1653_p11  ;;  %s200_s21 = scalar_lea.vmem [#allocation7], %s1578_s25 }
  0x3d   : > { %s207_s23 = sshll.u32 %s200_s21, 4  ;;  %s208_s23 = int_to_ptr.vmem [resolvable:$true] %s207_s23 }
  0x3e   : > { %p1670_p0 = pnand %p1226_p12, %p1892_p3 }
  0x40   : > { %s1663_s20 = scalar_lea.hbm %s1914_s2, %s1581_s26  ;;  %s1340_s14 = scalar_lea.hbm %s1914_s2, 256 }
  0x41   : > { %s1915_s27 = scalar_select %p1670_p0, 1, 0 }
  0x42   : > { %s1335_s30 = scalar_lea.hbm %s1663_s20, 128  ;;  %p1341_p4 = scmp.lt.u32.totalorder %s1663_s20, %s1914_s2 }
  0x43   : > { %p1336_p10 = scmp.ne.s32.totalorder %s1663_s20, %s1335_s30  ;;  %p1342_p9 = scmp.lt.u32.totalorder %s1340_s14, %s1335_s30 }
  0x44   : > { %p1344_p5 = scmp.lt.u32.totalorder %s1335_s30, %s1663_s20 }
  0x45   : > { %p1338_p13 = pnand %p1336_p10, %p1602_p8  ;;  %p1343_p7 = por %p1342_p9, %p1341_p4 }
  0x47   : > { %p1339_p2 = pneg %p1338_p13  ;;  %p1345_p12 = por %p1344_p5, %p1343_p7 }
  0x49   : > { %p1346_p3 = pnand %p1345_p12, %p1339_p2 }
  0x4b   : > { %1349 = shalt.err (!%p1346_p3)
}
  0x4c   : > { %s1350_s21 = scalar_lea.vmem %s208_s23, 128  ;;  %s1501_s22 = smov [#allocation7]  }
  0x4d   : > { %p1351_p1 = scmp.ne.s32.totalorder %s208_s23, %s1350_s21  ;;  %s1355_s19 = sshll.u32 %s1501_s22, 4  ;;  %s1356_s19 = int_to_ptr.vmem [resolvable:$false] %s1355_s19 }
  0x4e   : > { %s1357_s11 = scalar_lea.vmem %s1356_s19, 256  ;;  %p1358_p11 = scmp.lt.s32.totalorder %s208_s23, %s1356_s19 }
  0x4f   : > { %p1353_p10 = pnand %p1351_p1, %p1602_p8  ;;  %p1359_p0 = scmp.lt.s32.totalorder %s1357_s11, %s1350_s21 }
  0x51   : > { %p1354_p13 = pneg %p1353_p10  ;;  %p1360_p6 = por %p1359_p0, %p1358_p11 }
  0x53   : > { %p1361_p4 = pnand %p1360_p6, %p1354_p13 }
  0x55   : > { %1364 = shalt.err (!%p1361_p4)
}
  0x56   : > { %p1916_p9 = scmp.ne.s32.totalorder %s1907_s6, 0  ;;  %s1696_s30 = scalar_lea.hbm %s1887_s3, %s1581_s26 }
  0x57   : > { %s1365_s19 = scalar_lea.hbm %s1884_s0, 32  ;;  %p1917_p3 = scmp.ne.s32.totalorder %s1915_s27, 0 }
  0x58   : > { %1236 = dma.hbm_to_vmem [thread:$0]  (!%p1916_p9), %s1663_s20, 128, %s208_s23, %s1596_s7  }
  0x59   : > { %p1366_p6 = scmp.ne.s32.totalorder %s1884_s0, %s1365_s19  ;;  %p1367_p1 = pneg %p1917_p3 }
  0x5a   : > { %p1372_p11 = scmp.lt.u32.totalorder %s1365_s19, %s1884_s0 }
  0x5b   : > { %p1368_p5 = pnand %p1367_p1, %p1366_p6 }
  0x5d   : > { %p1369_p7 = pneg %p1368_p5 }
  0x5f   : > { %p1374_p0 = pnand %p1372_p11, %p1369_p7 }
  0x61   : > { %1377 = shalt.err (!%p1374_p0)
}
  0x62   : > { %s1378_s26 = scalar_lea.vmem %s1657_s12, 32  ;;  %p1386_p13 = scmp.lt.s32.totalorder %s1657_s12, %s1657_s12 }
  0x63   : > { %p1379_p2 = scmp.ne.s32.totalorder %s1657_s12, %s1378_s26  ;;  %p1387_p4 = scmp.lt.s32.totalorder %s1378_s26, %s1378_s26 }
  0x65   : > { %p1381_p12 = pnand %p1379_p2, %p1367_p1  ;;  %p1388_p9 = por %p1387_p4, %p1386_p13 }
  0x67   : > { %p1382_p10 = pneg %p1381_p12 }
  0x69   : > { %p1389_p8 = pnand %p1388_p9, %p1382_p10 }
  0x6b   : > { %1392 = shalt.err (!%p1389_p8)
}
  0x6c   : > { %1229 = dma.hbm_to_vmem [thread:$0]  (!%p1917_p3), %s1884_s0, 32, %s1657_s12, [#allocation3]  }
  0x6d   : > { %s218_s20 = scalar_lea.vmem [#allocation8], %s1578_s25  ;;  %s1918_s1 = sand.u32 1, %s1493_s17  }
  0x6e   : > { %s225_s23 = sshll.u32 %s218_s20, 4  ;;  %s215_s24 = scalar_lea.sflag [#allocation9], %s1918_s1  ;;  %s226_s23 = int_to_ptr.vmem [resolvable:$true] %s225_s23 }
  0x6f   : > { %s1393_s22 = scalar_lea.hbm %s1696_s30, 128  ;;  %p1919_p9 = scmp.ne.s32.totalorder %s1908_s9, 0 }
  0x70   : > { %p1394_p8 = scmp.ne.s32.totalorder %s1696_s30, %s1393_s22  ;;  %s1398_s19 = scalar_lea.hbm %s1887_s3, 256 }
  0x71   : > { %p1399_p5 = scmp.lt.u32.totalorder %s1696_s30, %s1887_s3  ;;  %p1400_p7 = scmp.lt.u32.totalorder %s1398_s19, %s1393_s22 }
  0x72   : > { %p1396_p6 = pnand %p1394_p8, %p1919_p9  ;;  %p1402_p11 = scmp.lt.u32.totalorder %s1393_s22, %s1696_s30 }
  0x73   : > { %p1401_p3 = por %p1400_p7, %p1399_p5 }
  0x74   : > { %p1397_p1 = pneg %p1396_p6 }
  0x75   : > { %p1403_p0 = por %p1402_p11, %p1401_p3 }
  0x77   : > { %p1404_p2 = pnand %p1403_p0, %p1397_p1 }
  0x79   : > { %1407 = shalt.err (!%p1404_p2)
}
  0x7a   : > { %s1408_s25 = scalar_lea.vmem %s226_s23, 128  ;;  %s1502_s12 = smov [#allocation8]  }
  0x7b   : > { %p1409_p12 = scmp.ne.s32.totalorder %s226_s23, %s1408_s25  ;;  %s1413_s11 = sshll.u32 %s1502_s12, 4  ;;  %s1414_s11 = int_to_ptr.vmem [resolvable:$false] %s1413_s11 }
  0x7c   : > { %s1415_s26 = scalar_lea.vmem %s1414_s11, 256  ;;  %p1416_p4 = scmp.lt.s32.totalorder %s226_s23, %s1414_s11 }
  0x7d   : > { %p1411_p10 = pnand %p1409_p12, %p1919_p9  ;;  %p1417_p8 = scmp.lt.s32.totalorder %s1415_s26, %s1408_s25 }
  0x7f   : > { %p1412_p13 = pneg %p1411_p10  ;;  %p1418_p6 = por %p1417_p8, %p1416_p4 }
  0x81   : > { %p1419_p5 = pnand %p1418_p6, %p1412_p13 }
  0x83   : > { %1422 = shalt.err (!%p1419_p5)
}
  0x84   : > { %p1920_p7 = scmp.ne.s32.totalorder %s1907_s6, 0  ;;  %p1921_p1 = scmp.ne.s32.totalorder %s1913_s10, 0 }
  0x85   : > { %p1922_p3 = scmp.eq.s32.totalorder (!%p1921_p1), %s1627_s28, 0 }
  0x86   : > { %1239 = dma.hbm_to_vmem [thread:$0]  (!%p1920_p7), %s1696_s30, 128, %s226_s23, %s215_s24  }
  0x87   : > { %234 = sbr.rel (%p1921_p1) target bundleno = 1304 (0x518), region = 36 }
  0x8e   : > { %1468 = dma.done.wait (%p1922_p3), [#allocation3], 32   ;;  %p1923_p9 = pmov %p1922_p3 }
  0x8f   : > { %s240_s9 = sand.u32 1, %s1627_s28   ;;  %s1747_s2 = sand.u32 1, %s1489_s16  }
  0x90   : > { %1470 = vsyncadd (%p1923_p9), [#allocation3], 4294967264  ;;  %s1750_s7 = sshll.u32 %s1747_s2, 3  ;;  %s241_s6 = scalar_lea.sflag [#allocation6], %s240_s9 }
  0x91   : > { %s244_s30 = scalar_lea.vmem [#allocation5], %s1750_s7  ;;  %p1924_p11 = scmp.ne.s32.totalorder %s1909_s8, 0 }
  0x93   : > { %1472 = dma.done.wait (%p1924_p11), %s241_s6, 256  }
  0x94   : > { %1474 = vsyncadd (%p1924_p11), %s241_s6, 4294967040  ;;  %s253_s10 = scalar_lea.vmem [#allocation7], %s1750_s7  ;;  %s259_s20 = scalar_lea.sflag [#allocation9], %s1747_s2 }
  0x95   : > { %s262_s23 = scalar_lea.vmem [#allocation8], %s1750_s7 }
  0x96   : > { %1476 = dma.done.wait (%p1924_p11), %s259_s20, 128  }
  0x97   : > { %1478 = vsyncadd (%p1924_p11), %s259_s20, 4294967168  ;;  %v301_v0 = vlaneseq  ;;  %v1503_v1 = vmov 0.0   ;;  %vm1504_vm0 = vmmov 0   ;;  %vm306_vm1 = vcmask 64512   ;;  %v299_v4 = vld [vmem:[%s253_s10] sm:$0xff]  ;;  %v298_v6 = vld [vmem:[%s244_s30] sm:$0xff] }
  0x98   : > { %1174 = vmatprep.subr.mxu0 %v1503_v1  ;;  %1176 = vmatprep.mubr.msk.f32.mxu0 %vm1504_vm0, %v1503_v1  ;;  %v1773_v5 = vld [vmem:[#allocation2] sm:$0x3]  ;;  %s1505_s8 = smov 120   ;;  %s1506_s1 = smov 112   ;;  %v300_v12 = vld [vmem:[%s262_s23] sm:$0xff]  ;;  %vm976_vm2 = vcmask 130048  }
  0x99   : > { %v1767_v2 = vshrl.u32 %v301_v0, 7  ;;  %1179 = vmatprep.subr.mxu1 %v1503_v1  ;;  %1181 = vmatprep.mubr.msk.f32.mxu1 %vm1504_vm0, %v1503_v1  ;;  %s1507_s24 = smov 104   ;;  %s1508_s22 = smov 8   ;;  %vm978_vm3 = vcmask 195584   ;;  %vm985_vm4 = vcmask 261120  }
  0x9a   : > { %1175 = vmatpush3.xpose.msk.msra.mxu0 %vm306_vm1, %v299_v4  ;;  %1180 = vmatpush3.msra.mxu1 %v300_v12  ;;  %s1509_s27 = smov 16   ;;  %s1510_s13 = smov 24  }
  0x9b   : > { %v303_v3 = vsub.s32 0, %v1767_v2  ;;  %1189 = vmatprep.subr.mxu0 %v1503_v1  ;;  %1184 = vmatprep.subr.mxu1 %v1503_v1  ;;  %s1155_s19 = sshll.u32 %s1627_s28, 7  ;;  %s296_s14 = scalar_lea.vmem [#allocation10], %s1750_s7 }
  0x9c   : > { %s1001_s21 = sshll.u32 %s296_s14, 4  ;;  %s1840_s11 = scalar_lea.hbm %s1888_s4, %s1155_s19  ;;  %s1842_s21 = int_to_ptr.vmem [resolvable:$true] %s1001_s21 }
  0x9d   : > { %v304_v7 = vrot.slane %v1773_v5, %v303_v3  ;;  %s988_s26 = scalar_lea.sflag [#allocation4], %s1747_s2  ;;  %s1423_s28 = scalar_lea.vmem %s1842_s21, 128 }
  0x9e   : > { %p1424_p0 = scmp.ne.s32.totalorder %s1842_s21, %s1423_s28  ;;  %p1925_p2 = scmp.ne.s32.totalorder %s1911_s29, 0 }
  0x9f   : > { %v305_v8 = vmul.f32 %v304_v7, %v298_v6  ;;  %s1511_s9 = smov [#allocation10]  }
  0xa0   : > { %p1425_p12 = pnand %p1424_p0, %p1925_p2  ;;  %s1427_s7 = sshll.u32 %s1511_s9, 4  ;;  %s1428_s7 = int_to_ptr.vmem [resolvable:$false] %s1427_s7 }
  0xa1   : > { %1177 = vmatmul.mubr.msk.f32.vlgmr.msra.gmra.mrb[0].mxu0 %vm306_vm1, %v305_v8  ;;  %467 = vrot.lane.b32.xlu1 %v305_v8, %s1505_s8  ;;  %s1429_s6 = scalar_lea.vmem %s1428_s7, 256  ;;  %p1430_p13 = scmp.lt.s32.totalorder %s1842_s21, %s1428_s7 }
  0xa2   : > { %1191 = vmatprep.mubr.msk.f32.mxu0 %vm1504_vm0, %v1503_v1  ;;  %p1426_p10 = pneg %p1425_p12  ;;  %p1431_p4 = scmp.lt.s32.totalorder %s1429_s6, %s1423_s28 }
  0xa4   : > { %p1432_p8 = por %p1431_p4, %p1430_p13 }
  0xa5   : > { %635 = vrot.lane.b32.xlu1 %v299_v4, %s1506_s1 }
  0xa6   : > { %p1433_p6 = pnand %p1432_p8, %p1426_p10 }
  0xa9   : > { %633 = vrot.lane.b32.xlu1 %v305_v8, %s1506_s1 }
  0xad   : > { %800 = vrot.lane.b32.xlu1 %v299_v4, %s1507_s24 }
  0xb1   : > { %798 = vrot.lane.b32.xlu1 %v305_v8, %s1507_s24  ;;  %v982_v8 = vsub.s32 1, %v1767_v2 }
 0x113   : > { %v468_v16 = vpop.permute.xlu1 %467 }
 0x117   : > { %v636_v17 = vpop.permute.xlu1 %635 }
 0x11b   : > { %v634_v20 = vpop.permute.xlu1 %633 }
 0x11f   : > { %v801_v21 = vpop.permute.xlu1 %800 }
 0x123   : > { %v799_v22 = vpop.permute.xlu1 %798 }
 0x174   : > { %v379_v9 = vpop.f32.mrb[0].mxu0 }
 0x175   : > { %v1178_v10 = vpop.f32.mrb[1].mxu0  ;;  %v383_v11 = vsel %vm306_vm1, %v379_v9, -inf }
 0x176   : > { %384 = vmax.xlane.f32.xlu0 %v383_v11 }
 0x18c   : > { %469 = vrot.lane.b32.xlu0 %v299_v4, %s1505_s8 }
 0x203   : > { %v385_v13 = vpop.xlane.xlu0 %384 }
 0x204   : > { %v386_v14 = vsub.f32 %v379_v9, %v385_v13 }
 0x206   : > { %v387_v15 = vmul.f32 1.442695, %v386_v14 }
 0x207   : > { %v470_v18 = vpop.permute.xlu0 %469 }
 0x208   : > { %1289 = vpow2.f32 %v387_v15 }
 0x212   : > { %v1791_v19 = vpop.eup %1289 }
 0x213   : > { %1182 = vmatmul.mubr.msk.f32.vlgmr.msra.gmra.mrb[0].mxu1 %vm306_vm1, %v1791_v19  ;;  %v389_v52 = vsel %vm306_vm1, %v1791_v19, 0.0 }
 0x214   : > { %1185 = vmatpush3.xpose.msk.msra.mxu1 %vm306_vm1, %v470_v18  ;;  %1186 = vmatprep.mubr.msk.f32.mxu1 %vm1504_vm0, %v1503_v1 }
 0x215   : > { %1194 = vmatprep.subr.mxu1 %v1503_v1 }
 0x217   : > { %1187 = vmatmul.mubr.msk.f32.vlgmr.msra.gmra.mrb[2].mxu1 %vm306_vm1, %v468_v16 }
 0x218   : > { %1195 = vmatpush3.xpose.msk.msra.mxu1 %vm306_vm1, %v636_v17  ;;  %1196 = vmatprep.mubr.msk.f32.mxu1 %vm1504_vm0, %v1503_v1 }
 0x219   : > { %1204 = vmatprep.subr.mxu1 %v1503_v1 }
 0x21b   : > { %1197 = vmatmul.mubr.msk.f32.vlgmr.msra.gmra.mrb[4].mxu1 %vm306_vm1, %v634_v20 }
 0x21c   : > { %1205 = vmatpush3.xpose.msk.msra.mxu1 %vm306_vm1, %v801_v21  ;;  %1206 = vmatprep.mubr.msk.f32.mxu1 %vm1504_vm0, %v1503_v1 }
 0x21f   : > { %1207 = vmatmul.mubr.msk.f32.vlgmr.msra.gmra.mrb[6].mxu1 %vm306_vm1, %v799_v22 }
 0x2e6   : > { %v1809_v23 = vpop.f32.mrb[0].mxu1 }
 0x2e7   : > { %v1183_v24 = vpop.f32.mrb[1].mxu1 }
 0x2ea   : > { %v541_v25 = vpop.f32.mrb[2].mxu1 }
 0x2eb   : > { %v1188_v26 = vpop.f32.mrb[3].mxu1  ;;  %v545_v27 = vsel %vm306_vm1, %v541_v25, -inf }
 0x2ec   : > { %546 = vmax.xlane.f32.xlu1 %v545_v27 }
 0x2ee   : > { %v707_v28 = vpop.f32.mrb[4].mxu1 }
 0x2ef   : > { %v711_v29 = vsel %vm306_vm1, %v707_v28, -inf  ;;  %v1198_v30 = vpop.f32.mrb[5].mxu1 }
 0x2f0   : > { %712 = vmax.xlane.f32.xlu0 %v711_v29 }
 0x2f2   : > { %v872_v31 = vpop.f32.mrb[6].mxu1 }
 0x2f3   : > { %v1208_v32 = vpop.f32.mrb[7].mxu1  ;;  %v876_v33 = vsel %vm306_vm1, %v872_v31, -inf }
 0x2fd   : > { %720 = vrot.lane.b32.xlu1 %v300_v12, %s1506_s1 }
 0x306   : > { %555 = vrot.lane.b32.xlu0 %v300_v12, %s1505_s8 }
 0x321   : > { %877 = vmax.xlane.f32.xlu1 %v876_v33 }
 0x332   : > { %885 = vrot.lane.b32.xlu1 %v300_v12, %s1507_s24  ;;  %v983_v12 = vrot.slane %v1773_v5, %v982_v8 }
 0x379   : > { %v547_v34 = vpop.xlane.xlu1 %546 }
 0x37a   : > { %v548_v35 = vsub.f32 %v541_v25, %v547_v34 }
 0x37c   : > { %v549_v36 = vmul.f32 1.442695, %v548_v35 }
 0x37d   : > { %v713_v37 = vpop.xlane.xlu0 %712  ;;  %v721_v42 = vpop.permute.xlu1 %720 }
 0x37e   : > { %1291 = vpow2.f32 %v549_v36  ;;  %v714_v38 = vsub.f32 %v707_v28, %v713_v37 }
 0x380   : > { %v715_v39 = vmul.f32 1.442695, %v714_v38 }
 0x381   : > { %v556_v40 = vpop.permute.xlu0 %555 }
 0x382   : > { %1293 = vpow2.f32 %v715_v39  ;;  %1190 = vmatpush3.msra.mxu0 %v556_v40 }
 0x383   : > { %1199 = vmatprep.subr.mxu0 %v1503_v1 }
 0x388   : > { %v1292_v41 = vpop.eup %1291 }
 0x389   : > { %1192 = vmatmul.mubr.msk.f32.vlgmr.msra.gmra.mrb[2].mxu0 %vm306_vm1, %v1292_v41  ;;  %v551_v43 = vsel %vm306_vm1, %v1292_v41, 0.0 }
 0x38a   : > { %1200 = vmatpush3.msra.mxu0 %v721_v42  ;;  %552 = vadd.xlane.f32.xlu0 %v551_v43 }
 0x38b   : > { %1201 = vmatprep.mubr.msk.f32.mxu0 %vm1504_vm0, %v1503_v1  ;;  %1209 = vmatprep.subr.mxu0 %v1503_v1 }
 0x38c   : > { %v1294_v44 = vpop.eup %1293 }
 0x38d   : > { %1202 = vmatmul.mubr.msk.f32.vlgmr.msra.gmra.mrb[4].mxu0 %vm306_vm1, %v1294_v44  ;;  %v717_v45 = vsel %vm306_vm1, %v1294_v44, 0.0 }
 0x38e   : > { %718 = vadd.xlane.f32.xlu1 %v717_v45  ;;  %1211 = vmatprep.mubr.msk.f32.mxu0 %vm1504_vm0, %v1503_v1 }
 0x3ae   : > { %v878_v46 = vpop.xlane.xlu1 %877 }
 0x3af   : > { %v879_v47 = vsub.f32 %v872_v31, %v878_v46 }
 0x3b1   : > { %v880_v48 = vmul.f32 1.442695, %v879_v47 }
 0x3b2   : > { %v886_v49 = vpop.permute.xlu1 %885 }
 0x3b3   : > { %1295 = vpow2.f32 %v880_v48  ;;  %1210 = vmatpush3.msra.mxu0 %v886_v49 }
 0x3bd   : > { %v1296_v50 = vpop.eup %1295 }
 0x3be   : > { %1212 = vmatmul.mubr.msk.f32.vlgmr.msra.gmra.mrb[6].mxu0 %vm306_vm1, %v1296_v50  ;;  %v882_v51 = vsel %vm306_vm1, %v1296_v50, 0.0 }
 0x3bf   : > { %883 = vadd.xlane.f32.xlu0 %v882_v51 }
 0x3c3   : > { %390 = vadd.xlane.f32.xlu0 %v389_v52 }
 0x417   : > { %v553_v53 = vpop.xlane.xlu0 %552 }
 0x418   : > { %1297 = vrcp.f32 %v553_v53 }
 0x41b   : > { %v719_v54 = vpop.xlane.xlu1 %718 }
 0x41c   : > { %1299 = vrcp.f32 %v719_v54 }
 0x422   : > { %v1298_v55 = vpop.eup %1297 }
 0x426   : > { %v1300_v59 = vpop.eup %1299 }
 0x44c   : > { %v884_v63 = vpop.xlane.xlu0 %883 }
 0x44d   : > { %1301 = vrcp.f32 %v884_v63 }
 0x450   : > { %v391_v6 = vpop.xlane.xlu0 %390 }
 0x451   : > { %1303 = vrcp.f32 %v391_v6 }
 0x457   : > { %v1302_v0 = vpop.eup %1301 }
 0x45b   : > { %v1304_v7 = vpop.eup %1303 }
 0x45c   : > { %v627_v56 = vpop.f32.mrb[2].mxu0  ;;  %v466_v10 = vmul.f32 %v1304_v7, %v1809_v23 }
 0x45d   : > { %v632_v57 = vmul.f32 %v1298_v55, %v627_v56  ;;  %v1193_v58 = vpop.f32.mrb[3].mxu0 }
 0x45f   : > { %964 = vrot.lane.b32.xlu1 %v632_v57, %s1508_s22 }
 0x460   : > { %v792_v60 = vpop.f32.mrb[4].mxu0 }
 0x461   : > { %v797_v61 = vmul.f32 %v1300_v59, %v792_v60  ;;  %v1203_v62 = vpop.f32.mrb[5].mxu0 }
 0x463   : > { %968 = vrot.lane.b32.xlu0 %v797_v61, %s1509_s27 }
 0x491   : > { %v957_v1 = vpop.f32.mrb[6].mxu0 }
 0x492   : > { %v962_v3 = vmul.f32 %v1302_v0, %v957_v1  ;;  %v1213_v4 = vpop.f32.mrb[7].mxu0 }
 0x494   : > { %972 = vrot.lane.b32.xlu1 %v962_v3, %s1510_s13 }
 0x4d1   : > { %v965_v9 = vpop.permute.xlu1 %964 }
 0x4d2   : > { %v975_v13 = vsel %vm306_vm1, %v466_v10, %v965_v9 }
 0x4d5   : > { %v969_v11 = vpop.permute.xlu0 %968 }
 0x4d6   : > { %v977_v14 = vsel %vm976_vm2, %v975_v13, %v969_v11 }
 0x506   : > { %v973_v15 = vpop.permute.xlu1 %972 }
 0x507   : > { %v979_v16 = vsel %vm978_vm3, %v977_v14, %v973_v15 }
 0x508   : > { %v984_v2 = vmul.f32 %v983_v12, %v979_v16 }
 0x50a   : > { %986 = vst.msk [vmem:[%s296_s14] sm:$0xff] %vm985_vm4, %v984_v2 }
 0x50b   : > { %1436 = shalt.err (!%p1433_p6)
}
 0x50c   : > { %s1437_s2 = scalar_lea.hbm %s1840_s11, 128  ;;  %s1441_s20 = scalar_lea.hbm %s1888_s4, 256 }
 0x50d   : > { %p1438_p5 = scmp.ne.s32.totalorder %s1840_s11, %s1437_s2  ;;  %p1442_p3 = scmp.lt.u32.totalorder %s1840_s11, %s1888_s4 }
 0x50e   : > { %p1443_p9 = scmp.lt.u32.totalorder %s1441_s20, %s1437_s2  ;;  %p1445_p0 = scmp.lt.u32.totalorder %s1437_s2, %s1840_s11 }
 0x50f   : > { %p1439_p7 = pnand %p1438_p5, %p1925_p2 }
 0x510   : > { %p1444_p11 = por %p1443_p9, %p1442_p3 }
 0x511   : > { %p1440_p1 = pneg %p1439_p7 }
 0x512   : > { %p1446_p12 = por %p1445_p0, %p1444_p11 }
 0x514   : > { %p1447_p10 = pnand %p1446_p12, %p1440_p1 }
 0x516   : > { %1450 = shalt.err (!%p1447_p10)
}
 0x517   : > { %1224 = dma.vmem_to_hbm [thread:$0]  (%p1925_p2), %s1842_s21, 128, %s1840_s11, %s988_s26  }
 0x518 PF: > { %s1013_s1 = sand.u32 1, %s1485_s15   ;;  %p1926_p13 = scmp.ne.s32.totalorder %s1912_s5, 0 }
 0x519   : > { %p1927_p4 = scmp.ge.s32.totalorder %s1497_s18, 2  ;;  %s1014_s24 = scalar_lea.sflag [#allocation4], %s1013_s1 }
 0x51b   : > { %p1241_p8 = pnand %p1927_p4, %p1926_p13 }
 0x51d   : > { %1480 = dma.done.wait (!%p1241_p8), %s1014_s24, 128  }
 0x51e   : > { %1482 = vsyncadd (!%p1241_p8), %s1014_s24, 4294967168  ;;  %s1928_s18 = sld [smem:[#allocation15_spill]]  ;;  %s1929_s22 = sld [smem:[#allocation16_spill]] }
 0x51f   : > { %s1930_s15 = smov %s1489_s16  ;;  %s1931_s16 = smov %s1493_s17 }
 0x524   : > { %p21_p6 = scmp.ge.s32.totalorder %s1928_s18, 4   ;;  %s1932_s17 = smov %s1929_s22 }
 0x526   :  { %23 = sbr.rel (!%p21_p6) target bundleno = 11 (0xb), region = 110 }
 0x52d   :  { %1019 = vsyncpa [#allocation3], 1 }
 0x52e   :  { %1021 = vsyncpa [#allocation3 + $0x1], 1 }
 0x52f   :  { %1022 = vsyncpa [#allocation6], 1 }
 0x530   :  { %1024 = vsyncpa [#allocation6 + $0x1], 1 }
 0x531   :  { %1025 = vsyncpa [#allocation9], 1 }
 0x532   :  { %1027 = vsyncpa [#allocation9 + $0x1], 1 }
 0x533   :  { %1028 = vsyncpa [#allocation4], 1 }
 0x534   :  { %1030 = vsyncpa [#allocation4 + $0x1], 1 }

</bundles_post_ra>
